<compile_context>
chip_gen: v7x
topology: tpu7x:2x2x1
jax: 0.10.0
libtpu: 0.0.40
codegen_flags: <defaults>
</compile_context>

<pallas_src>
import functools

import jax
import jax.numpy as jnp
import numpy as np
from jax.experimental import pallas as pl
from jax.experimental.pallas import tpu as pltpu

EPS = 1e-6


def _layernorm(x, eps=EPS):
    mean = jnp.mean(x, axis=-1, keepdims=True)
    var = jnp.mean(jnp.square(x - mean), axis=-1, keepdims=True)
    return (x - mean) * jax.lax.rsqrt(var + eps)


def _gelu_tanh(x):
    c = 0.7978845608028654  # sqrt(2/pi)
    return 0.5 * x * (1.0 + jnp.tanh(c * (x + 0.044715 * x * x * x)))


def _time_mining_block_kernel(
    x_ref, hmo_ref,
    wq_ref, bq_ref, wk_ref, bk_ref, wv_ref, bv_ref, wo_ref, bo_ref,
    w1_ref, b1_ref, w2_ref, b2_ref,
    o_ref,
    *, seq_len, dim_head, matmul_dtype,
):
    N = seq_len
    scale = float(dim_head) ** -0.5
    cdt = matmul_dtype

    def dot2(a, b):                              # (M,K) @ (K,N) on the MXU
        return jnp.dot(a.astype(cdt), b.astype(cdt),
                       preferred_element_type=jnp.float32)

    def dot3(a, b):                              # (B,M,K) @ (K,N) on the MXU
        return jax.lax.dot_general(a.astype(cdt), b.astype(cdt),
                                   (((2,), (0,)), ((), ())),
                                   preferred_element_type=jnp.float32)

    x = x_ref[...]                               # (bt, N, C) f32

    # ---- norm1 over the whole slab (query row + past rows share it) ----
    xn = _layernorm(x)                           # (bt, N, C)
    cur = xn[:, N - 1, :]                        # (bt, C)

    # query projection; attention scale folded in
    q = (dot2(cur, wq_ref[...]) + bq_ref[...]) * scale          # (bt, inner)

    # k / v projections over ALL rows; the query row is masked out of the
    # softmax below so it contributes exactly zero (avoids a 7-sublane slice)
    k = dot3(xn, wk_ref[...]) + bk_ref[...]      # (bt, N, inner)
    v = dot3(xn, wv_ref[...]) + bv_ref[...]      # (bt, N, inner)

    # per-head similarity replicated across each head's lanes (lane-dense):
    #   sim[b, j, c] = sum_{c' in head(c)} q[b, c'] * k[b, j, c']
    # hmo is the block-diagonal (inner, inner) ones matrix -> fuses the
    # per-head reduction AND the head expansion into one MXU dispatch.
    prod = q[:, None, :] * k                     # (bt, N, inner)
    sim = dot3(prod, hmo_ref[...])               # (bt, N, inner)

    # attention is over past rows only -> mask the query row
    j_idx = jax.lax.broadcasted_iota(jnp.int32, sim.shape, 1)
    sim = jnp.where(j_idx < N - 1, sim, -1e30)

    sim = sim - jnp.max(sim, axis=1, keepdims=True)
    p = jnp.exp(sim)                             # (bt, N, inner)
    denom = jnp.sum(p, axis=1, keepdims=True)    # (bt, 1, inner) lane-dense
    inv = pl.reciprocal(denom, approx=True)      # EUP slot
    inv = inv * (2.0 - denom * inv)              # one Newton step (keeps 1e-4)
    p = p * inv

    # weighted sum of values; p is already expanded across each head's lanes
    o_heads = jnp.sum(p * v, axis=1)             # (bt, inner)

    attn_out = dot2(o_heads, wo_ref[...]) + bo_ref[...]          # (bt, C)

    # ---- residual on last row + norm2 + MLP (all batched over bt) ----
    x_last = x[:, N - 1, :] + attn_out           # (bt, C)
    yn = _layernorm(x_last)
    h1 = dot2(yn, w1_ref[...]) + b1_ref[...]
    h2 = dot2(_gelu_tanh(h1), w2_ref[...]) + b2_ref[...]
    x_last = x_last + h2                         # (bt, C)

    # write back only the updated last token
    o_ref[...] = x_last[:, None, :].astype(o_ref.dtype)


def _vmem_bytes(bt, N, C, inner, H, w_itemsize):
    """Rough VMEM footprint: double-buffered x tile + f32 temps + weights."""
    act = 12 * bt * N * max(C, inner) * 4
    weights = 2 * w_itemsize * (3 * C * inner + inner * C + 2 * C * H + inner * inner)
    biases = 2 * 4 * (3 * inner + 2 * C + H)
    return act + weights + biases


def _pick_block_b(B, N, C, inner, H, w_itemsize, block_b, vmem_budget):
    bt = max(1, min(block_b, B))
    # biggest block that fits the (v7x-safe) VMEM budget
    while bt > 1 and _vmem_bytes(bt, N, C, inner, H, w_itemsize) > vmem_budget:
        bt //= 2
    # keep >= 2 "parallel" grid steps so both v7x TensorCores get work
    if B >= 2 and pl.cdiv(B, bt) < 2:
        bt = pl.cdiv(B, 2)
    return bt


def time_mining_block(x, params, *, num_heads, dim_head, block_b=256,
                      matmul_dtype=jnp.float32):
    """Pallas forward of timeMiningBlock. Weights pre-transposed to (in, out)."""
    B, N, C = x.shape
    inner = num_heads * dim_head
    assert C == inner, "timeMiningBlock requires hidden_size == num_heads * dim_head"
    assert N >= 2, "TimeMining needs at least one past token (N >= 2)"
    H = params["w1"].shape[1]

    w_itemsize = jnp.dtype(matmul_dtype).itemsize
    bt = _pick_block_b(B, N, C, inner, H, w_itemsize, block_b,
                       vmem_budget=32 * 1024 * 1024)
    B_pad = pl.cdiv(B, bt) * bt
    grid = (B_pad // bt,)
    vmem_limit = int(min(48 * 1024 * 1024,
                         max(16 * 1024 * 1024,
                             2 * _vmem_bytes(bt, N, C, inner, H, w_itemsize))))

    # pad B up to a multiple of bt (padded rows are finite garbage, sliced off)
    x_p = x if B_pad == B else jnp.pad(x, ((0, B_pad - B), (0, 0), (0, 0)))

    # wrapper-side layout plumbing: split the fused kv projection so the kernel
    # never slices the lane axis, and build the block-diagonal (inner, inner)
    # head map that fuses the per-head loop + head expansion into one MXU op.
    wk = params["wkv"][:, :inner]
    wv = params["wkv"][:, inner:]
    bk = params["bkv"][:, :inner]
    bv = params["bkv"][:, inner:]
    head_ids = np.arange(inner) // dim_head
    hm_outer = jnp.asarray((head_ids[:, None] == head_ids[None, :]).astype(np.float32))

    cast_w = (lambda w: w) if jnp.dtype(matmul_dtype) == jnp.dtype(jnp.float32) \
        else (lambda w: w.astype(matmul_dtype))

    args = (x_p, hm_outer,
            cast_w(params["wq"]), params["bq"], cast_w(wk), bk, cast_w(wv), bv,
            cast_w(params["wo"]), params["bo"],
            cast_w(params["w1"]), params["b1"], cast_w(params["w2"]), params["b2"])

    kernel = functools.partial(_time_mining_block_kernel, seq_len=N,
                               dim_head=dim_head, matmul_dtype=matmul_dtype)

    def full(shape):
        return pl.BlockSpec(shape, lambda b: (0,) * len(shape))

    in_specs = [
        pl.BlockSpec((bt, N, C), lambda b: (b, 0, 0)),    # x
        full((inner, inner)),                             # block-diag head map
        full((C, inner)), full((1, inner)),               # wq, bq
        full((C, inner)), full((1, inner)),               # wk, bk
        full((C, inner)), full((1, inner)),               # wv, bv
        full((inner, C)), full((1, C)),                   # wo, bo
        full((C, H)),     full((1, H)),                   # w1, b1
        full((H, C)),     full((1, C)),                   # w2, b2
    ]
    cparams = pltpu.CompilerParams(dimension_semantics=("parallel",),
                                   vmem_limit_bytes=vmem_limit)

    def build(aliased):
        if aliased:
            # write the (bt, 1, C) last-token window straight into the aliased
            # x buffer -> only bt*C written back per step, no wrapper scatter.
            out_shape = jax.ShapeDtypeStruct((B_pad, N, C), x.dtype)
            out_specs = pl.BlockSpec((bt, 1, C), lambda b: (b, N - 1, 0))
            io_alias = {0: 0}
        else:
            out_shape = jax.ShapeDtypeStruct((B_pad, 1, C), x.dtype)
            out_specs = pl.BlockSpec((bt, 1, C), lambda b: (b, 0, 0))
            io_alias = {}
        return pl.pallas_call(
            kernel,
            out_shape=out_shape,
            grid_spec=pltpu.PrefetchScalarGridSpec(
                num_scalar_prefetch=0, grid=grid,
                in_specs=in_specs, out_specs=out_specs),
            input_output_aliases=io_alias,
            compiler_params=cparams,
        )

    try:
        out_p = build(aliased=True)(*args)
    except Exception:
        # Guaranteed-legal fallback: compact (B, 1, C) output + wrapper update.
        last = build(aliased=False)(*args)
        out_p = x_p.at[:, -1, :].set(last[:, 0, :])

    return out_p if B_pad == B else out_p[:B]


def reference_forward(x, params, *, num_heads, dim_head):
    """Pure-JAX reference mirroring the PyTorch forward."""
    B, N, C = x.shape
    inner = num_heads * dim_head
    scale = float(dim_head) ** -0.5

    xn = _layernorm(x)
    past = xn[:, :-1, :]
    cur = xn[:, -1:, :]
    q = cur @ params["wq"] + params["bq"]                 # (B, 1, inner)
    kv = past @ params["wkv"] + params["bkv"]             # (B, N-1, 2*inner)
    k, v = kv[..., :inner], kv[..., inner:]

    q = q.reshape(B, 1, num_heads, dim_head).transpose(0, 2, 1, 3)
    k = k.reshape(B, N - 1, num_heads, dim_head).transpose(0, 2, 1, 3)
    v = v.reshape(B, N - 1, num_heads, dim_head).transpose(0, 2, 1, 3)

    sim = jnp.einsum("bhqd,bhkd->bhqk", q, k) * scale
    attn = jax.nn.softmax(sim, axis=-1)
    o = jnp.einsum("bhqk,bhkd->bhqd", attn, v)
    o = o.transpose(0, 2, 1, 3).reshape(B, 1, C)
    attn_out = o @ params["wo"] + params["bo"]            # (B, 1, C)

    x_last = x[:, -1, :] + attn_out[:, 0, :]
    yn = _layernorm(x_last)
    h1 = _gelu_tanh(yn @ params["w1"] + params["b1"])
    h2 = h1 @ params["w2"] + params["b2"]
    x_last = x_last + h2
    return x.at[:, -1, :].set(x_last)


if __name__ == "__main__":
    # hidden_size must equal num_heads * 48 for the PyTorch module to type-check
    num_heads, dim_head = 2, 48
    C = num_heads * dim_head              # 96
    H = int(C * 4.0)                      # 384 (mlp_ratio=4.0)
    inner = num_heads * dim_head          # == C

    key = jax.random.PRNGKey(0)
    ks = jax.random.split(key, 12)

    def init(k, shape, scale=0.02):
        return scale * jax.random.normal(k, shape, jnp.float32)

    params = {
        "wq":  init(ks[1], (C, inner)),        # to_q.weight.T   (qkv_bias=True)
        "bq":  init(ks[2], (1, inner)),
        "wkv": init(ks[3], (C, 2 * inner)),    # to_kv.weight.T
        "bkv": init(ks[4], (1, 2 * inner)),
        "wo":  init(ks[5], (inner, C)),        # to_out.weight.T
        "bo":  init(ks[6], (1, C)),
        "w1":  init(ks[7], (C, H)),            # mlp.fc1.weight.T
        "b1":  init(ks[8], (1, H)),
        "w2":  init(ks[9], (H, C)),            # mlp.fc2.weight.T
        "b2":  init(ks[10], (1, C)),
    }

    # main check: B divisible by the chosen block (grid = 2 parallel steps)
    B, N = 8, 8
    x = jax.random.normal(ks[0], (B, N, C), jnp.float32)
    out = time_mining_block(x, params, num_heads=num_heads, dim_head=dim_head)
    out = jax.block_until_ready(out)
    ref = reference_forward(x, params, num_heads=num_heads, dim_head=dim_head)
    np.testing.assert_allclose(np.asarray(out), np.asarray(ref), rtol=1e-4, atol=1e-4)

    # second check: B that needs padding to a multiple of the batch block
    B2 = 5
    x2 = jax.random.normal(ks[11], (B2, N, C), jnp.float32)
    out2 = time_mining_block(x2, params, num_heads=num_heads, dim_head=dim_head)
    out2 = jax.block_until_ready(out2)
    ref2 = reference_forward(x2, params, num_heads=num_heads, dim_head=dim_head)
    np.testing.assert_allclose(np.asarray(out2), np.asarray(ref2), rtol=1e-4, atol=1e-4)

    print("KERNEL_OK")
</pallas_src>

<mosaic_0001>
module attributes {stable_mosaic.version = 11 : i64} {
  func.func @_time_mining_block_kernel(%arg0: i32, %arg1: memref<4x8x96xf32, #tpu.memory_space<vmem>>, %arg2: memref<96x96xf32, #tpu.memory_space<vmem>>, %arg3: memref<96x96xf32, #tpu.memory_space<vmem>>, %arg4: memref<1x96xf32, #tpu.memory_space<vmem>>, %arg5: memref<96x96xf32, #tpu.memory_space<vmem>>, %arg6: memref<1x96xf32, #tpu.memory_space<vmem>>, %arg7: memref<96x96xf32, #tpu.memory_space<vmem>>, %arg8: memref<1x96xf32, #tpu.memory_space<vmem>>, %arg9: memref<96x96xf32, #tpu.memory_space<vmem>>, %arg10: memref<1x96xf32, #tpu.memory_space<vmem>>, %arg11: memref<96x384xf32, #tpu.memory_space<vmem>>, %arg12: memref<1x384xf32, #tpu.memory_space<vmem>>, %arg13: memref<384x96xf32, #tpu.memory_space<vmem>>, %arg14: memref<1x96xf32, #tpu.memory_space<vmem>>, %arg15: memref<4x1x96xf32, #tpu.memory_space<vmem>>) attributes {dimension_semantics = [#tpu.dimension_semantics<parallel>], iteration_bounds = array<i64: 2>, scalar_prefetch = 0 : i64, scratch_operands = 0 : i64, tpu.core_type = #tpu.core_type<tc>, window_params = [{transform_indices = @transform_0, window_bounds = array<i64: 4, 8, 96>}, {pipeline_mode = #tpu.pipeline_mode<synchronous>, transform_indices = @transform_1, window_bounds = array<i64: 96, 96>}, {pipeline_mode = #tpu.pipeline_mode<synchronous>, transform_indices = @transform_2, window_bounds = array<i64: 96, 96>}, {pipeline_mode = #tpu.pipeline_mode<synchronous>, transform_indices = @transform_3, window_bounds = array<i64: 1, 96>}, {pipeline_mode = #tpu.pipeline_mode<synchronous>, transform_indices = @transform_4, window_bounds = array<i64: 96, 96>}, {pipeline_mode = #tpu.pipeline_mode<synchronous>, transform_indices = @transform_5, window_bounds = array<i64: 1, 96>}, {pipeline_mode = #tpu.pipeline_mode<synchronous>, transform_indices = @transform_6, window_bounds = array<i64: 96, 96>}, {pipeline_mode = #tpu.pipeline_mode<synchronous>, transform_indices = @transform_7, window_bounds = array<i64: 1, 96>}, {pipeline_mode = #tpu.pipeline_mode<synchronous>, transform_indices = @transform_8, window_bounds = array<i64: 96, 96>}, {pipeline_mode = #tpu.pipeline_mode<synchronous>, transform_indices = @transform_9, window_bounds = array<i64: 1, 96>}, {pipeline_mode = #tpu.pipeline_mode<synchronous>, transform_indices = @transform_10, window_bounds = array<i64: 96, 384>}, {pipeline_mode = #tpu.pipeline_mode<synchronous>, transform_indices = @transform_11, window_bounds = array<i64: 1, 384>}, {pipeline_mode = #tpu.pipeline_mode<synchronous>, transform_indices = @transform_12, window_bounds = array<i64: 384, 96>}, {pipeline_mode = #tpu.pipeline_mode<synchronous>, transform_indices = @transform_13, window_bounds = array<i64: 1, 96>}, {transform_indices = @transform_14, window_bounds = array<i64: 4, 1, 96>}]} {
    %c0 = arith.constant 0 : index
    %c0_0 = arith.constant 0 : index
    %c0_1 = arith.constant 0 : index
    %0 = vector.load %arg1[%c0, %c0_0, %c0_1] : memref<4x8x96xf32, #tpu.memory_space<vmem>>, vector<4x8x96xf32>
    %cst = arith.constant dense<0.000000e+00> : vector<4x8xf32>
    %1 = vector.multi_reduction <add>, %0, %cst [2] : vector<4x8x96xf32> to vector<4x8xf32>
    %2 = vector.shape_cast %1 : vector<4x8xf32> to vector<4x8x1xf32>
    %cst_2 = arith.constant 9.600000e+01 : f32
    %3 = vector.broadcast %cst_2 : f32 to vector<4x8x1xf32>
    %4 = arith.divf %2, %3 : vector<4x8x1xf32>
    %5 = vector.broadcast %4 : vector<4x8x1xf32> to vector<4x8x96xf32>
    %6 = arith.subf %0, %5 : vector<4x8x96xf32>
    %7 = arith.mulf %6, %6 : vector<4x8x96xf32>
    %cst_3 = arith.constant dense<0.000000e+00> : vector<4x8xf32>
    %8 = vector.multi_reduction <add>, %7, %cst_3 [2] : vector<4x8x96xf32> to vector<4x8xf32>
    %9 = vector.shape_cast %8 : vector<4x8xf32> to vector<4x8x1xf32>
    %cst_4 = arith.constant 9.600000e+01 : f32
    %10 = vector.broadcast %cst_4 : f32 to vector<4x8x1xf32>
    %11 = arith.divf %9, %10 : vector<4x8x1xf32>
    %12 = vector.broadcast %4 : vector<4x8x1xf32> to vector<4x8x96xf32>
    %13 = arith.subf %0, %12 : vector<4x8x96xf32>
    %cst_5 = arith.constant 9.99999997E-7 : f32
    %14 = vector.broadcast %cst_5 : f32 to vector<4x8x1xf32>
    %15 = arith.addf %11, %14 : vector<4x8x1xf32>
    %16 = math.rsqrt %15 : vector<4x8x1xf32>
    %17 = vector.broadcast %16 : vector<4x8x1xf32> to vector<4x8x96xf32>
    %18 = arith.mulf %13, %17 : vector<4x8x96xf32>
    %19 = vector.extract_strided_slice %18 {offsets = [0, 7, 0], sizes = [4, 1, 96], strides = [1, 1, 1]} : vector<4x8x96xf32> to vector<4x1x96xf32>
    %20 = vector.shape_cast %19 : vector<4x1x96xf32> to vector<4x96xf32>
    %c0_6 = arith.constant 0 : index
    %c0_7 = arith.constant 0 : index
    %21 = vector.load %arg3[%c0_6, %c0_7] : memref<96x96xf32, #tpu.memory_space<vmem>>, vector<96x96xf32>
    %cst_8 = arith.constant dense<0.000000e+00> : vector<4x96xf32>
    %22 = tpu.matmul %20, %21, %cst_8 {dimension_numbers = #tpu.dot_dimension_numbers<[1], [0], [0], [1], [0, 0, 1, 1], [], []>} : vector<4x96xf32>, vector<96x96xf32>, vector<4x96xf32> -> vector<4x96xf32>
    %c0_9 = arith.constant 0 : index
    %c0_10 = arith.constant 0 : index
    %23 = vector.load %arg4[%c0_9, %c0_10] : memref<1x96xf32, #tpu.memory_space<vmem>>, vector<1x96xf32>
    %24 = vector.broadcast %23 : vector<1x96xf32> to vector<4x96xf32>
    %25 = arith.addf %22, %24 : vector<4x96xf32>
    %cst_11 = arith.constant 0.144337565 : f32
    %26 = vector.broadcast %cst_11 : f32 to vector<4x96xf32>
    %27 = arith.mulf %25, %26 : vector<4x96xf32>
    %c0_12 = arith.constant 0 : index
    %c0_13 = arith.constant 0 : index
    %28 = vector.load %arg5[%c0_12, %c0_13] : memref<96x96xf32, #tpu.memory_space<vmem>>, vector<96x96xf32>
    %cst_14 = arith.constant dense<0.000000e+00> : vector<4x8x96xf32>
    %29 = tpu.matmul %18, %28, %cst_14 {dimension_numbers = #tpu.dot_dimension_numbers<[2], [0], [0, 1], [1], [0, 0, 0, 1, 1, 1], [], []>} : vector<4x8x96xf32>, vector<96x96xf32>, vector<4x8x96xf32> -> vector<4x8x96xf32>
    %c0_15 = arith.constant 0 : index
    %c0_16 = arith.constant 0 : index
    %30 = vector.load %arg6[%c0_15, %c0_16] : memref<1x96xf32, #tpu.memory_space<vmem>>, vector<1x96xf32>
    %31 = vector.shape_cast %30 : vector<1x96xf32> to vector<1x1x96xf32>
    %32 = vector.broadcast %31 : vector<1x1x96xf32> to vector<4x8x96xf32>
    %33 = arith.addf %29, %32 : vector<4x8x96xf32>
    %c0_17 = arith.constant 0 : index
    %c0_18 = arith.constant 0 : index
    %34 = vector.load %arg7[%c0_17, %c0_18] : memref<96x96xf32, #tpu.memory_space<vmem>>, vector<96x96xf32>
    %cst_19 = arith.constant dense<0.000000e+00> : vector<4x8x96xf32>
    %35 = tpu.matmul %18, %34, %cst_19 {dimension_numbers = #tpu.dot_dimension_numbers<[2], [0], [0, 1], [1], [0, 0, 0, 1, 1, 1], [], []>} : vector<4x8x96xf32>, vector<96x96xf32>, vector<4x8x96xf32> -> vector<4x8x96xf32>
    %c0_20 = arith.constant 0 : index
    %c0_21 = arith.constant 0 : index
    %36 = vector.load %arg8[%c0_20, %c0_21] : memref<1x96xf32, #tpu.memory_space<vmem>>, vector<1x96xf32>
    %37 = vector.shape_cast %36 : vector<1x96xf32> to vector<1x1x96xf32>
    %38 = vector.broadcast %37 : vector<1x1x96xf32> to vector<4x8x96xf32>
    %39 = arith.addf %35, %38 : vector<4x8x96xf32>
    %40 = vector.shape_cast %27 : vector<4x96xf32> to vector<4x1x96xf32>
    %41 = vector.broadcast %40 : vector<4x1x96xf32> to vector<4x8x96xf32>
    %42 = arith.mulf %41, %33 : vector<4x8x96xf32>
    %c0_22 = arith.constant 0 : index
    %c0_23 = arith.constant 0 : index
    %43 = vector.load %arg2[%c0_22, %c0_23] : memref<96x96xf32, #tpu.memory_space<vmem>>, vector<96x96xf32>
    %cst_24 = arith.constant dense<0.000000e+00> : vector<4x8x96xf32>
    %44 = tpu.matmul %42, %43, %cst_24 {dimension_numbers = #tpu.dot_dimension_numbers<[2], [0], [0, 1], [1], [0, 0, 0, 1, 1, 1], [], []>} : vector<4x8x96xf32>, vector<96x96xf32>, vector<4x8x96xf32> -> vector<4x8x96xf32>
    %45 = tpu.iota {dimensions = array<i32: 1>} : vector<4x8x96xi32>
    %c7_i32 = arith.constant 7 : i32
    %46 = vector.broadcast %c7_i32 : i32 to vector<4x8x96xi32>
    %47 = arith.cmpi slt, %45, %46 : vector<4x8x96xi32>
    %cst_25 = arith.constant -1.000000e+30 : f32
    %48 = vector.broadcast %cst_25 : f32 to vector<4x8x96xf32>
    %49 = arith.select %47, %44, %48 : vector<4x8x96xi1>, vector<4x8x96xf32>
    %cst_26 = arith.constant dense<0xFF800000> : vector<4x96xf32>
    %50 = vector.multi_reduction <maximumf>, %49, %cst_26 [1] : vector<4x8x96xf32> to vector<4x96xf32>
    %51 = vector.shape_cast %50 : vector<4x96xf32> to vector<4x1x96xf32>
    %52 = vector.broadcast %51 : vector<4x1x96xf32> to vector<4x8x96xf32>
    %53 = arith.subf %49, %52 : vector<4x8x96xf32>
    %54 = math.exp %53 : vector<4x8x96xf32>
    %cst_27 = arith.constant dense<0.000000e+00> : vector<4x96xf32>
    %55 = vector.multi_reduction <add>, %54, %cst_27 [1] : vector<4x8x96xf32> to vector<4x96xf32>
    %56 = vector.shape_cast %55 : vector<4x96xf32> to vector<4x1x96xf32>
    %57 = tpu.reciprocal %56 {approx = true} : vector<4x1x96xf32> -> vector<4x1x96xf32>
    %58 = arith.mulf %56, %57 : vector<4x1x96xf32>
    %cst_28 = arith.constant 2.000000e+00 : f32
    %59 = vector.broadcast %cst_28 : f32 to vector<4x1x96xf32>
    %60 = arith.subf %59, %58 : vector<4x1x96xf32>
    %61 = arith.mulf %57, %60 : vector<4x1x96xf32>
    %62 = vector.broadcast %61 : vector<4x1x96xf32> to vector<4x8x96xf32>
    %63 = arith.mulf %54, %62 : vector<4x8x96xf32>
    %64 = arith.mulf %63, %39 : vector<4x8x96xf32>
    %cst_29 = arith.constant dense<0.000000e+00> : vector<4x96xf32>
    %65 = vector.multi_reduction <add>, %64, %cst_29 [1] : vector<4x8x96xf32> to vector<4x96xf32>
    %c0_30 = arith.constant 0 : index
    %c0_31 = arith.constant 0 : index
    %66 = vector.load %arg9[%c0_30, %c0_31] : memref<96x96xf32, #tpu.memory_space<vmem>>, vector<96x96xf32>
    %cst_32 = arith.constant dense<0.000000e+00> : vector<4x96xf32>
    %67 = tpu.matmul %65, %66, %cst_32 {dimension_numbers = #tpu.dot_dimension_numbers<[1], [0], [0], [1], [0, 0, 1, 1], [], []>} : vector<4x96xf32>, vector<96x96xf32>, vector<4x96xf32> -> vector<4x96xf32>
    %c0_33 = arith.constant 0 : index
    %c0_34 = arith.constant 0 : index
    %68 = vector.load %arg10[%c0_33, %c0_34] : memref<1x96xf32, #tpu.memory_space<vmem>>, vector<1x96xf32>
    %69 = vector.broadcast %68 : vector<1x96xf32> to vector<4x96xf32>
    %70 = arith.addf %67, %69 : vector<4x96xf32>
    %71 = vector.extract_strided_slice %0 {offsets = [0, 7, 0], sizes = [4, 1, 96], strides = [1, 1, 1]} : vector<4x8x96xf32> to vector<4x1x96xf32>
    %72 = vector.shape_cast %71 : vector<4x1x96xf32> to vector<4x96xf32>
    %73 = arith.addf %72, %70 : vector<4x96xf32>
    %cst_35 = arith.constant dense<0.000000e+00> : vector<4xf32>
    %74 = vector.multi_reduction <add>, %73, %cst_35 [1] : vector<4x96xf32> to vector<4xf32>
    %75 = vector.shape_cast %74 : vector<4xf32> to vector<4x1xf32>
    %cst_36 = arith.constant 9.600000e+01 : f32
    %76 = vector.broadcast %cst_36 : f32 to vector<4x1xf32>
    %77 = arith.divf %75, %76 : vector<4x1xf32>
    %78 = vector.broadcast %77 : vector<4x1xf32> to vector<4x96xf32>
    %79 = arith.subf %73, %78 : vector<4x96xf32>
    %80 = arith.mulf %79, %79 : vector<4x96xf32>
    %cst_37 = arith.constant dense<0.000000e+00> : vector<4xf32>
    %81 = vector.multi_reduction <add>, %80, %cst_37 [1] : vector<4x96xf32> to vector<4xf32>
    %82 = vector.shape_cast %81 : vector<4xf32> to vector<4x1xf32>
    %cst_38 = arith.constant 9.600000e+01 : f32
    %83 = vector.broadcast %cst_38 : f32 to vector<4x1xf32>
    %84 = arith.divf %82, %83 : vector<4x1xf32>
    %85 = vector.broadcast %77 : vector<4x1xf32> to vector<4x96xf32>
    %86 = arith.subf %73, %85 : vector<4x96xf32>
    %cst_39 = arith.constant 9.99999997E-7 : f32
    %87 = vector.broadcast %cst_39 : f32 to vector<4x1xf32>
    %88 = arith.addf %84, %87 : vector<4x1xf32>
    %89 = math.rsqrt %88 : vector<4x1xf32>
    %90 = vector.broadcast %89 : vector<4x1xf32> to vector<4x96xf32>
    %91 = arith.mulf %86, %90 : vector<4x96xf32>
    %c0_40 = arith.constant 0 : index
    %c0_41 = arith.constant 0 : index
    %92 = vector.load %arg11[%c0_40, %c0_41] : memref<96x384xf32, #tpu.memory_space<vmem>>, vector<96x384xf32>
    %cst_42 = arith.constant dense<0.000000e+00> : vector<4x384xf32>
    %93 = tpu.matmul %91, %92, %cst_42 {dimension_numbers = #tpu.dot_dimension_numbers<[1], [0], [0], [1], [0, 0, 1, 1], [], []>} : vector<4x96xf32>, vector<96x384xf32>, vector<4x384xf32> -> vector<4x384xf32>
    %c0_43 = arith.constant 0 : index
    %c0_44 = arith.constant 0 : index
    %94 = vector.load %arg12[%c0_43, %c0_44] : memref<1x384xf32, #tpu.memory_space<vmem>>, vector<1x384xf32>
    %95 = vector.broadcast %94 : vector<1x384xf32> to vector<4x384xf32>
    %96 = arith.addf %93, %95 : vector<4x384xf32>
    %cst_45 = arith.constant 5.000000e-01 : f32
    %97 = vector.broadcast %cst_45 : f32 to vector<4x384xf32>
    %98 = arith.mulf %97, %96 : vector<4x384xf32>
    %cst_46 = arith.constant 4.471500e-02 : f32
    %99 = vector.broadcast %cst_46 : f32 to vector<4x384xf32>
    %100 = arith.mulf %99, %96 : vector<4x384xf32>
    %101 = arith.mulf %100, %96 : vector<4x384xf32>
    %102 = arith.mulf %101, %96 : vector<4x384xf32>
    %103 = arith.addf %96, %102 : vector<4x384xf32>
    %cst_47 = arith.constant 0.797884583 : f32
    %104 = vector.broadcast %cst_47 : f32 to vector<4x384xf32>
    %105 = arith.mulf %104, %103 : vector<4x384xf32>
    %106 = math.tanh %105 : vector<4x384xf32>
    %cst_48 = arith.constant 1.000000e+00 : f32
    %107 = vector.broadcast %cst_48 : f32 to vector<4x384xf32>
    %108 = arith.addf %107, %106 : vector<4x384xf32>
    %109 = arith.mulf %98, %108 : vector<4x384xf32>
    %c0_49 = arith.constant 0 : index
    %c0_50 = arith.constant 0 : index
    %110 = vector.load %arg13[%c0_49, %c0_50] : memref<384x96xf32, #tpu.memory_space<vmem>>, vector<384x96xf32>
    %cst_51 = arith.constant dense<0.000000e+00> : vector<4x96xf32>
    %111 = tpu.matmul %109, %110, %cst_51 {dimension_numbers = #tpu.dot_dimension_numbers<[1], [0], [0], [1], [0, 0, 1, 1], [], []>} : vector<4x384xf32>, vector<384x96xf32>, vector<4x96xf32> -> vector<4x96xf32>
    %c0_52 = arith.constant 0 : index
    %c0_53 = arith.constant 0 : index
    %112 = vector.load %arg14[%c0_52, %c0_53] : memref<1x96xf32, #tpu.memory_space<vmem>>, vector<1x96xf32>
    %113 = vector.broadcast %112 : vector<1x96xf32> to vector<4x96xf32>
    %114 = arith.addf %111, %113 : vector<4x96xf32>
    %115 = arith.addf %73, %114 : vector<4x96xf32>
    %116 = vector.shape_cast %115 : vector<4x96xf32> to vector<4x1x96xf32>
    %c0_54 = arith.constant 0 : index
    %c0_55 = arith.constant 0 : index
    %c0_56 = arith.constant 0 : index
    %117 = vector.load %arg15[%c0_54, %c0_55, %c0_56] : memref<4x1x96xf32, #tpu.memory_space<vmem>>, vector<4x1x96xf32>
    tpu.vector_store %arg15[%c0_54, %c0_55, %c0_56], %116 {strides = array<i32>} : memref<4x1x96xf32, #tpu.memory_space<vmem>>, vector<4x1x96xf32>,
    return
  }
  func.func @transform_0(%arg0: i32) -> (i32, i32, i32) {
    %c0_i32 = arith.constant 0 : i32
    %c0_i32_0 = arith.constant 0 : i32
    %c0_i32_1 = arith.constant 0 : i32
    return %arg0, %c0_i32, %c0_i32_0 : i32, i32, i32
  }
  func.func @transform_1(%arg0: i32) -> (i32, i32) {
    %c0_i32 = arith.constant 0 : i32
    %c0_i32_0 = arith.constant 0 : i32
    %c0_i32_1 = arith.constant 0 : i32
    return %c0_i32, %c0_i32_0 : i32, i32
  }
  func.func @transform_2(%arg0: i32) -> (i32, i32) {
    %c0_i32 = arith.constant 0 : i32
    %c0_i32_0 = arith.constant 0 : i32
    %c0_i32_1 = arith.constant 0 : i32
    return %c0_i32, %c0_i32_0 : i32, i32
  }
  func.func @transform_3(%arg0: i32) -> (i32, i32) {
    %c0_i32 = arith.constant 0 : i32
    %c0_i32_0 = arith.constant 0 : i32
    %c0_i32_1 = arith.constant 0 : i32
    return %c0_i32, %c0_i32_0 : i32, i32
  }
  func.func @transform_4(%arg0: i32) -> (i32, i32) {
    %c0_i32 = arith.constant 0 : i32
    %c0_i32_0 = arith.constant 0 : i32
    %c0_i32_1 = arith.constant 0 : i32
    return %c0_i32, %c0_i32_0 : i32, i32
  }
  func.func @transform_5(%arg0: i32) -> (i32, i32) {
    %c0_i32 = arith.constant 0 : i32
    %c0_i32_0 = arith.constant 0 : i32
    %c0_i32_1 = arith.constant 0 : i32
    return %c0_i32, %c0_i32_0 : i32, i32
  }
  func.func @transform_6(%arg0: i32) -> (i32, i32) {
    %c0_i32 = arith.constant 0 : i32
    %c0_i32_0 = arith.constant 0 : i32
    %c0_i32_1 = arith.constant 0 : i32
    return %c0_i32, %c0_i32_0 : i32, i32
  }
  func.func @transform_7(%arg0: i32) -> (i32, i32) {
    %c0_i32 = arith.constant 0 : i32
    %c0_i32_0 = arith.constant 0 : i32
    %c0_i32_1 = arith.constant 0 : i32
    return %c0_i32, %c0_i32_0 : i32, i32
  }
  func.func @transform_8(%arg0: i32) -> (i32, i32) {
    %c0_i32 = arith.constant 0 : i32
    %c0_i32_0 = arith.constant 0 : i32
    %c0_i32_1 = arith.constant 0 : i32
    return %c0_i32, %c0_i32_0 : i32, i32
  }
  func.func @transform_9(%arg0: i32) -> (i32, i32) {
    %c0_i32 = arith.constant 0 : i32
    %c0_i32_0 = arith.constant 0 : i32
    %c0_i32_1 = arith.constant 0 : i32
    return %c0_i32, %c0_i32_0 : i32, i32
  }
  func.func @transform_10(%arg0: i32) -> (i32, i32) {
    %c0_i32 = arith.constant 0 : i32
    %c0_i32_0 = arith.constant 0 : i32
    %c0_i32_1 = arith.constant 0 : i32
    return %c0_i32, %c0_i32_0 : i32, i32
  }
  func.func @transform_11(%arg0: i32) -> (i32, i32) {
    %c0_i32 = arith.constant 0 : i32
    %c0_i32_0 = arith.constant 0 : i32
    %c0_i32_1 = arith.constant 0 : i32
    return %c0_i32, %c0_i32_0 : i32, i32
  }
  func.func @transform_12(%arg0: i32) -> (i32, i32) {
    %c0_i32 = arith.constant 0 : i32
    %c0_i32_0 = arith.constant 0 : i32
    %c0_i32_1 = arith.constant 0 : i32
    return %c0_i32, %c0_i32_0 : i32, i32
  }
  func.func @transform_13(%arg0: i32) -> (i32, i32) {
    %c0_i32 = arith.constant 0 : i32
    %c0_i32_0 = arith.constant 0 : i32
    %c0_i32_1 = arith.constant 0 : i32
    return %c0_i32, %c0_i32_0 : i32, i32
  }
  func.func @transform_14(%arg0: i32) -> (i32, i32, i32) {
    %c0_i32 = arith.constant 0 : i32
    %c0_i32_0 = arith.constant 0 : i32
    %c0_i32_1 = arith.constant 0 : i32
    return %arg0, %c0_i32, %c0_i32_0 : i32, i32, i32
  }
}

</mosaic_0001>

<bundles_post_ra>
// kernel: tpu_custom_call.1
= control target key start
LH: loop header
LB: loop body
LE: loop exit
PB: predicated region body
PF: predicated region fallthrough
CT: control target
= control target key end

     0   :  { %s3621_s0 = inlined_call_operand.hbm [shape: f32[8,8,96], index: 0, kind: input, shape index: {}]   ;;  %s3622_s1 = inlined_call_operand.vmem [shape: f32[96,96], index: 1, kind: input, shape index: {}]   ;;  %s3623_s2 = inlined_call_operand.vmem [shape: f32[96,96], index: 2, kind: input, shape index: {}]   ;;  %s3624_s3 = inlined_call_operand.vmem [shape: f32[1,96], index: 3, kind: input, shape index: {}]   ;;  %s3625_s4 = inlined_call_operand.vmem [shape: f32[96,96], index: 4, kind: input, shape index: {}]   ;;  %s3626_s5 = inlined_call_operand.vmem [shape: f32[1,96], index: 5, kind: input, shape index: {}]   ;;  %s3627_s6 = inlined_call_operand.vmem [shape: f32[96,96], index: 6, kind: input, shape index: {}]   ;;  %s3628_s7 = inlined_call_operand.vmem [shape: f32[1,96], index: 7, kind: input, shape index: {}]   ;;  %s3629_s8 = inlined_call_operand.hbm [shape: f32[96,96], index: 8, kind: input, shape index: {}]   ;;  %s3630_s9 = inlined_call_operand.vmem [shape: f32[1,96], index: 9, kind: input, shape index: {}]   ;;  %s3631_s10 = inlined_call_operand.vmem [shape: f32[96,384], index: 10, kind: input, shape index: {}]   ;;  %s3632_s11 = inlined_call_operand.vmem [shape: f32[1,384], index: 11, kind: input, shape index: {}]   ;;  %s3633_s12 = inlined_call_operand.vmem [shape: f32[384,96], index: 12, kind: input, shape index: {}]   ;;  %s3634_s13 = inlined_call_operand.vmem [shape: f32[1,96], index: 13, kind: input, shape index: {}]   ;;  %s3635_s14 = inlined_call_operand.hbm [shape: f32[8,1,96], index: 14, kind: output, shape index: {}]  }
   0x1   :  { %3646 = sst [smem:[#allocation14_spill]] %s3632_s11 }
   0x2   :  { %3647 = sst [smem:[#allocation15_spill]] %s3633_s12 }
   0x3   :  { %3648 = sst [smem:[#allocation16_spill]] %s3634_s13 }
   0x4   :  { %3649 = sst [smem:[#allocation17_spill]] %s3635_s14 }
   0x5   :  { %19 = vsyncpa [#allocation3], 0 }
   0x6   :  { %21 = vsyncpa [#allocation3 + $0x1], 0 }
   0x7   :  { %22 = vsyncpa [#allocation6], 0 }
   0x8   :  { %23 = vsyncpa [#allocation4], 0 }
   0x9   :  { %25 = vsyncpa [#allocation4 + $0x1], 0  ;;  %s2801_s29 = smov 0   ;;  %s2803_s30 = smov 0  }
   0xa   :  { %s2805_s15 = smov 0   ;;  %s2807_s16 = smov 0  }
   0xb LB: > { %3650 = sst [smem:[#allocation11_spill]] %s2701_s29  ;;  %s2822_s17 = sadd.s32 4294967295, %s2713_s16   ;;  %s2713_s16 = sphi %s2807_s16, %s3674_s16   ;;  %s2709_s15 = sphi %s2805_s15, %s3677_s15   ;;  %s2705_s30 = sphi %s2803_s30, %s3676_s30   ;;  %s2701_s29 = sphi %s2801_s29, %s3675_s29  }
   0xc   : > { %s1896_s18 = sadd.s32 4294967294, %s2713_s16   ;;  %p51_p0 = scmp.ne.s32.totalorder %s2705_s30, %s2701_s29 }
   0xd   : > { %p3641_p1 = scmp.eq.s32.totalorder %s2822_s17, 0  ;;  %p354_p3 = scmp.eq.s32.totalorder %s1896_s18, 1 }
   0xe   : > { %p1897_p5 = scmp.ge.s32.totalorder %s2713_s16, 1  ;;  %p361_p7 = scmp.lt.s32.totalorder %s2713_s16, 3 }
   0xf   : > { %p2831_p4 = por %p3641_p1, %p51_p0  ;;  %p2836_p6 = por %p354_p3, %p51_p0 }
  0x10   : > { %p2841_p8 = pnand %p1897_p5, %p361_p7  ;;  %s2715_s22 = smov [#allocation5]  }
  0x11   : > { %s3651_s19 = scalar_select %p2831_p4, 1, 0 }
  0x12   : > { %s3652_s20 = scalar_select %p2836_p6, 1, 0 }
  0x13   : > { %s3654_s21 = scalar_select %p2841_p8, 1, 0 }
  0x14   : > { %3653 = sst [smem:[#allocation12_spill]] %s3652_s20  ;;  %s394_s23 = sshll.u32 %s2715_s22, 4  ;;  %s2845_s23 = int_to_ptr.vmem [resolvable:$true] %s394_s23 }
  0x15   : > { %p2494_p9 = pneg %p2841_p8  ;;  %s2857_s25 = sadd.s32 1, %s2713_s16  }
  0x16   : > { %3656 = sst [smem:[#allocation13_spill]] %s2857_s25  ;;  %s38_s26 = sadd.s32 1, %s2709_s15 }
  0x17   : > { %p2852_p11 = pnand %p2494_p9, %p3641_p1  ;;  %s35_s27 = ssub.s32 %s2713_s16, %s2857_s25 }
  0x18   : > { %s2585_s22 = scalar_lea.hbm %s3629_s8, 1536 }
  0x19   : > { %p2586_p12 = scmp.ne.s32.totalorder %s3629_s8, %s2585_s22  ;;  %p2587_p13 = pneg %p2852_p11 }
  0x1a   : > { %p2592_p5 = scmp.lt.u32.totalorder %s2585_s22, %s3629_s8 }
  0x1b   : > { %p2588_p0 = pnand %p2587_p13, %p2586_p12 }
  0x1d   : > { %p2589_p3 = pneg %p2588_p0 }
  0x1f   : > { %p2594_p7 = pnand %p2592_p5, %p2589_p3 }
  0x21   : > { %2597 = shalt.err (!%p2594_p7)
}
  0x22   : > { %s2598_s25 = scalar_lea.vmem %s2845_s23, 1536  ;;  %p2606_p2 = scmp.lt.s32.totalorder %s2845_s23, %s2845_s23 }
  0x23   : > { %p2599_p9 = scmp.ne.s32.totalorder %s2845_s23, %s2598_s25  ;;  %p2607_p6 = scmp.lt.s32.totalorder %s2598_s25, %s2598_s25 }
  0x25   : > { %p2601_p10 = pnand %p2599_p9, %p2587_p13  ;;  %p2608_p4 = por %p2607_p6, %p2606_p2 }
  0x27   : > { %p2602_p1 = pneg %p2601_p10 }
  0x29   : > { %p2609_p8 = pnand %p2608_p4, %p2602_p1 }
  0x2b   : > { %2612 = shalt.err (!%p2609_p8)
}
  0x2c   : > { %s3645_s29 = smov 128   ;;  %s2717_s13 = smov 8  }
  0x2d   : > { %2497 = dma.hbm_to_vmem [thread:$0]  (!%p2852_p11), %s3629_s8, 1536, %s2845_s23, [#allocation6], %s3645_s29, %s3645_s29, %s2717_s13  }
  0x2e   : > { %p36_p1 = scmp.eq.s32.totalorder %s35_s27, 0  ;;  %p45_p2 = scmp.ne.s32.totalorder %s2709_s15, %s2705_s30 }
  0x2f   : > { %p46_p4 = scmp.eq.s32.totalorder %s2713_s16, 0  ;;  %p2507_p6 = scmp.lt.s32.totalorder %s2713_s16, 2 }
  0x30   : > { %s2891_s25 = scalar_select %p36_p1, %s2709_s15, %s38_s26  }
  0x31   : > { %p47_p8 = por %p46_p4, %p45_p2  ;;  %p3657_p10 = scmp.eq.s32.totalorder %s2822_s17, 1 }
  0x32   : > { %s423_s24 = sand.u32 1, %s2709_s15   ;;  %s1933_s18 = sshll.u32 %s2713_s16, 9 }
  0x33   : > { %p2895_p12 = por %p3657_p10, %p45_p2  ;;  %s1900_s22 = sshll.u32 %s423_s24, 5 }
  0x34   : > { %s2904_s14 = scalar_lea.hbm %s3621_s0, %s1933_s18  ;;  %s427_s23 = scalar_lea.vmem [#allocation2], %s1900_s22 }
  0x35   : > { %s434_s26 = sshll.u32 %s427_s23, 4  ;;  %p2906_p11 = pnand %p2507_p6, %p47_p8  ;;  %s2910_s26 = int_to_ptr.vmem [resolvable:$true] %s434_s26 }
  0x36   : > { %s2912_s20 = scalar_lea.sflag [#allocation3], %s423_s24  ;;  %s2613_s29 = scalar_lea.hbm %s2904_s14, 512 }
  0x37   : > { %p2614_p13 = scmp.ne.s32.totalorder %s2904_s14, %s2613_s29  ;;  %p2615_p0 = pneg %p2906_p11 }
  0x38   : > { %s2618_s18 = scalar_lea.hbm %s3621_s0, 1024  ;;  %p2619_p7 = scmp.lt.u32.totalorder %s2904_s14, %s3621_s0 }
  0x39   : > { %p2616_p3 = pnand %p2615_p0, %p2614_p13  ;;  %p2620_p9 = scmp.lt.u32.totalorder %s2618_s18, %s2613_s29 }
  0x3a   : > { %p2622_p2 = scmp.lt.u32.totalorder %s2613_s29, %s2904_s14 }
  0x3b   : > { %p2617_p5 = pneg %p2616_p3  ;;  %p2621_p1 = por %p2620_p9, %p2619_p7 }
  0x3d   : > { %p2623_p4 = por %p2622_p2, %p2621_p1 }
  0x3f   : > { %p2624_p6 = pnand %p2623_p4, %p2617_p5 }
  0x41   : > { %2627 = shalt.err (!%p2624_p6)
}
  0x42   : > { %s2628_s24 = scalar_lea.vmem %s2910_s26, 512  ;;  %s2718_s11 = smov [#allocation2]  }
  0x43   : > { %p2629_p8 = scmp.ne.s32.totalorder %s2910_s26, %s2628_s24  ;;  %s2633_s12 = sshll.u32 %s2718_s11, 4  ;;  %s2634_s12 = int_to_ptr.vmem [resolvable:$false] %s2633_s12 }
  0x44   : > { %s2635_s22 = scalar_lea.vmem %s2634_s12, 1024  ;;  %p2636_p3 = scmp.lt.s32.totalorder %s2910_s26, %s2634_s12 }
  0x45   : > { %p2631_p10 = pnand %p2629_p8, %p2615_p0  ;;  %p2637_p7 = scmp.lt.s32.totalorder %s2635_s22, %s2628_s24 }
  0x47   : > { %p2632_p13 = pneg %p2631_p10  ;;  %p2638_p9 = por %p2637_p7, %p2636_p3 }
  0x49   : > { %p2639_p1 = pnand %p2638_p9, %p2632_p13 }
  0x4b   : > { %2642 = shalt.err (!%p2639_p1)
}
  0x4c   : > { %s3660_s29 = smov 128   ;;  %p3661_p0 = scmp.ne.s32.totalorder %s3654_s21, 0 }
  0x4d   : > { %2501 = dma.hbm_to_vmem [thread:$0]  (!%p2906_p11), %s2904_s14, 512, %s2910_s26, %s2912_s20, %s3660_s29, %s3660_s29, %s2717_s13  }
  0x4e   : > { %446 = sbr.rel (%p3661_p0) target bundleno = 1955 (0x7a3), region = 76  ;;  %s2946_s18 = sand.u32 (!%p3661_p0), 1, %s2705_s30  }
  0x4f   : > { %s1904_s23 = sshll.u32 (!%p3661_p0), %s2946_s18, 5  ;;  %s449_s24 = scalar_lea.sflag (!%p3661_p0), [#allocation3], %s2946_s18 }
  0x50   : > { %s452_s11 = scalar_lea.vmem (!%p3661_p0), [#allocation2], %s1904_s23  ;;  %p3662_p5 = scmp.ne.s32.totalorder (!%p3661_p0), %s3651_s19, 0 }
  0x55   : > { %2688 = dma.done.wait (%p3662_p5), %s449_s24, 512  }
  0x56   : > { %2690 = vsyncadd (%p3662_p5), %s449_s24, 4294966784  ;;  %p3663_p2 = scmp.eq.s32.totalorder %s2822_s17, 0 }
  0x58   : > { %2692 = dma.done.wait (%p3663_p2), [#allocation6], 1536   ;;  %p3664_p11 = pmov %p3663_p2 }
  0x59   : > { %vm507_vm0 = vcmask 785408   ;;  %v2958_v0 = vld [vmem:[%s452_s11] sm:$0xff]  ;;  %v2960_v1 = vld [vmem:[%s452_s11 + $0x10] sm:$0xff]  ;;  %v2962_v2 = vld [vmem:[%s452_s11 + $0x8] sm:$0xff]  ;;  %v2719_v36 = vmov 0.0|0.0   ;;  %vm2720_vm1 = vmmov 0  }
  0x5a   : > { %2694 = vsyncadd (%p3664_p11), [#allocation6], 4294965760  ;;  %v508_v3 = vsel %vm507_vm0, %v2958_v0, 0.0  ;;  %v514_v4 = vsel %vm507_vm0, %v2960_v1, 0.0  ;;  %v2968_v5 = vld [vmem:[%s452_s11 + $0x18] sm:$0xff]  ;;  %v511_v6 = vsel %vm507_vm0, %v2962_v2, 0.0  ;;  %2280 = vmatprep.subr.bf16.mxu0 %v2719_v36 }
  0x5b   : > { %509 = vadd.xlane.f32.xlu0 %v508_v3  ;;  %515 = vadd.xlane.f32.xlu1 %v514_v4  ;;  %v517_v7 = vsel %vm507_vm0, %v2968_v5, 0.0  ;;  %v667_v8 = vld [vmem:[%s3625_s4] sm:$0xff]  ;;  %v668_v9 = vld [vmem:[%s3625_s4 + $0x8] sm:$0xff]  ;;  %v669_v31 = vld [vmem:[%s3625_s4 + $0x10] sm:$0xff]  ;;  %vm586_vm2 = vcmask 1041409   ;;  %vm589_vm3 = vcmask 1042434  }
  0x5c   : > { %v2298_v10 = vpack.c.bf16 %v668_v9, %v667_v8  ;;  %v670_v32 = vld [vmem:[%s3625_s4 + $0x18] sm:$0xff]  ;;  %v561_v34 = vld [vmem:[%s3623_s2] sm:$0xff]  ;;  %v562_v35 = vld [vmem:[%s3623_s2 + $0x8] sm:$0xff]  ;;  %vm592_vm4 = vcmask 1043459   ;;  %vm1290_vm6 = vcmask 785415   ;;  %vm1294_vm7 = vcmask 780288  }
  0x5d   : > { %v2302_v33 = vpack.c.bf16 %v670_v32, %v669_v31  ;;  %v2281_v37 = vpack.c.bf16 %v562_v35, %v561_v34  ;;  %v671_v38 = vld [vmem:[%s3625_s4 + $0x20] sm:$0xff]  ;;  %v672_v39 = vld [vmem:[%s3625_s4 + $0x28] sm:$0xff]  ;;  %v563_v41 = vld [vmem:[%s3623_s2 + $0x10] sm:$0xff]  ;;  %s3665_s29 = sld [smem:[#allocation15_spill]]  ;;  %s3667_s24 = sld [smem:[#allocation14_spill]] }
  0x5e   : > { %2299 = vmatprep.subr.bf16.mxu1 %v2298_v10  ;;  %v2306_v40 = vpack.c.bf16 %v672_v39, %v671_v38  ;;  %v564_v42 = vld [vmem:[%s3623_s2 + $0x18] sm:$0xff]  ;;  %v673_v44 = vld [vmem:[%s3625_s4 + $0x30] sm:$0xff]  ;;  %v565_v47 = vld [vmem:[%s3623_s2 + $0x20] sm:$0xff]  ;;  %s1906_s11 = sshll.u32 %s2946_s18, 2  ;;  %s3668_s13 = sld [smem:[#allocation16_spill]] }
  0x5f   : > { %512 = vadd.xlane.f32.xlu0 %v511_v6  ;;  %518 = vadd.xlane.f32.xlu1 %v517_v7  ;;  %v2284_v43 = vpack.c.bf16 %v564_v42, %v563_v41  ;;  %v674_v45 = vld [vmem:[%s3625_s4 + $0x38] sm:$0xff]  ;;  %v566_v48 = vld [vmem:[%s3623_s2 + $0x28] sm:$0xff]  ;;  %v675_v50 = vld [vmem:[%s3625_s4 + $0x40] sm:$0xff]  ;;  %v2721_v7 = vmov 0.0   ;;  %s1934_s14 = sshll.u32 %s2822_s17, 6  ;;  %s500_s26 = scalar_lea.vmem [#allocation7], %s1906_s11 }
  0x60   : > { %2301 = vmatpush3.bf16.msra.mxu1 %v2298_v10  ;;  %2282 = vmatpush3.bf16.msra.mxu0 %v2281_v37  ;;  %v2310_v46 = vpack.c.bf16 %v674_v45, %v673_v44  ;;  %v2287_v49 = vpack.c.bf16 %v566_v48, %v565_v47  ;;  %v676_v51 = vld [vmem:[%s3625_s4 + $0x48] sm:$0xff]  ;;  %v567_v53 = vld [vmem:[%s3623_s2 + $0x30] sm:$0xff]  ;;  %v568_v54 = vld [vmem:[%s3623_s2 + $0x38] sm:$0xff]  ;;  %s1813_s27 = sshll.u32 %s500_s26, 4  ;;  %s3669_s22 = sld [smem:[#allocation17_spill]]  ;;  %s3569_s27 = int_to_ptr.vmem [resolvable:$true] %s1813_s27 }
  0x61   : > { %2303 = vmatprep.subr.bf16.mxu1 %v2302_v33  ;;  %2283 = vmatprep.subr.bf16.mxu0 %v2719_v36  ;;  %v2314_v52 = vpack.c.bf16 %v676_v51, %v675_v50  ;;  %v677_v55 = vld [vmem:[%s3625_s4 + $0x50] sm:$0xff]  ;;  %v2290_v56 = vpack.c.bf16 %v568_v54, %v567_v53  ;;  %v678_v57 = vld [vmem:[%s3625_s4 + $0x58] sm:$0xff]  ;;  %v569_v59 = vld [vmem:[%s3623_s2 + $0x40] sm:$0xff]  ;;  %s1800_s17 = scalar_lea.sflag [#allocation4], %s2946_s18  ;;  %s2723_s11 = smov [#allocation7]  }
  0x62   : > { %v2318_v58 = vpack.c.bf16 %v678_v57, %v677_v55  ;;  %v570_v60 = vld [vmem:[%s3623_s2 + $0x48] sm:$0xff]  ;;  %v571_v62 = vld [vmem:[%s3623_s2 + $0x50] sm:$0xff]  ;;  %v572_v63 = vld [vmem:[%s3623_s2 + $0x58] sm:$0xff]  ;;  %2098 = vmatprep.mubr.msk.f32.mxu0 %vm2720_vm1, %v2721_v7  ;;  %s2647_s19 = sshll.u32 %s2723_s11, 4  ;;  %s2648_s19 = int_to_ptr.vmem [resolvable:$false] %s2647_s19 }
  0x63   : > { %v2293_v61 = vpack.c.bf16 %v570_v60, %v569_v59  ;;  %v2296_v3 = vpack.c.bf16 %v572_v63, %v571_v62  ;;  %v779_v4 = vld [vmem:[%s3627_s6] sm:$0xff]  ;;  %v780_v6 = vld [vmem:[%s3627_s6 + $0x8] sm:$0xff]  ;;  %v786_v47 = vld [vmem:[%s3627_s6 + $0x38] sm:$0xff]  ;;  %s3666_s23 = smov %s3665_s29  ;;  %s2649_s21 = scalar_lea.vmem %s2648_s19, 128 }
  0x64   : > { %2305 = vmatpush3.bf16.msra.mxu1 %v2302_v33  ;;  %2285 = vmatpush3.bf16.msra.mxu0 %v2284_v43  ;;  %v2322_v8 = vpack.c.bf16 %v780_v6, %v779_v4  ;;  %v932_v9 = vld [vmem:[%s3622_s1] sm:$0xff]  ;;  %v933_v10 = vld [vmem:[%s3622_s1 + $0x8] sm:$0xff]  ;;  %v790_v53 = vld [vmem:[%s3627_s6 + $0x58] sm:$0xff]  ;;  %p2650_p10 = scmp.lt.s32.totalorder %s3569_s27, %s2648_s19 }
  0x65   : > { %2307 = vmatprep.subr.bf16.mxu1 %v2306_v40  ;;  %2286 = vmatprep.subr.bf16.mxu0 %v2719_v36  ;;  %v783_v43 = vld [vmem:[%s3627_s6 + $0x20] sm:$0xff]  ;;  %v784_v44 = vld [vmem:[%s3627_s6 + $0x28] sm:$0xff]  ;;  %v934_v55 = vld [vmem:[%s3622_s1 + $0x10] sm:$0xff] }
  0x66   : > { %v2330_v45 = vpack.c.bf16 %v784_v44, %v783_v43  ;;  %v788_v50 = vld [vmem:[%s3627_s6 + $0x48] sm:$0xff]  ;;  %v939_v62 = vld [vmem:[%s3622_s1 + $0x38] sm:$0xff] }
  0x67   : > { %v937_v59 = vld [vmem:[%s3622_s1 + $0x28] sm:$0xff] }
  0x68   : > { %2309 = vmatpush3.bf16.msra.mxu1 %v2306_v40  ;;  %2288 = vmatpush3.bf16.msra.mxu0 %v2287_v49  ;;  %v787_v49 = vld [vmem:[%s3627_s6 + $0x40] sm:$0xff]  ;;  %v941_v4 = vld [vmem:[%s3622_s1 + $0x48] sm:$0xff] }
  0x69   : > { %2311 = vmatprep.subr.bf16.mxu1 %v2310_v46  ;;  %2289 = vmatprep.subr.bf16.mxu0 %v2719_v36  ;;  %v2338_v51 = vpack.c.bf16 %v788_v50, %v787_v49 }
  0x6c   : > { %2313 = vmatpush3.bf16.msra.mxu1 %v2310_v46  ;;  %2291 = vmatpush3.bf16.msra.mxu0 %v2290_v56  ;;  %v785_v46 = vld [vmem:[%s3627_s6 + $0x30] sm:$0xff]  ;;  %v935_v56 = vld [vmem:[%s3622_s1 + $0x18] sm:$0xff] }
  0x6d   : > { %2315 = vmatprep.subr.bf16.mxu1 %v2314_v52  ;;  %2292 = vmatprep.subr.bf16.mxu0 %v2719_v36  ;;  %v2334_v48 = vpack.c.bf16 %v786_v47, %v785_v46  ;;  %v2350_v57 = vpack.c.bf16 %v935_v56, %v934_v55  ;;  %v1171_v55 = vld [vmem:[#allocation5 + $0x18] sm:$0xff] }
  0x70   : > { %2317 = vmatpush3.bf16.msra.mxu1 %v2314_v52  ;;  %2294 = vmatpush3.bf16.msra.mxu0 %v2293_v61  ;;  %v789_v52 = vld [vmem:[%s3627_s6 + $0x50] sm:$0xff] }
  0x71   : > { %2319 = vmatprep.subr.bf16.mxu1 %v2318_v58  ;;  %2295 = vmatprep.subr.bf16.mxu0 %v2719_v36  ;;  %v2342_v54 = vpack.c.bf16 %v790_v53, %v789_v52  ;;  %v938_v61 = vld [vmem:[%s3622_s1 + $0x30] sm:$0xff]  ;;  %v1169_v52 = vld [vmem:[#allocation5 + $0x8] sm:$0xff] }
  0x72   : > { %v2358_v63 = vpack.c.bf16 %v939_v62, %v938_v61  ;;  %v1175_v61 = vld [vmem:[#allocation5 + $0x38] sm:$0xff] }
  0x74   : > { %2321 = vmatpush3.bf16.msra.mxu1 %v2318_v58  ;;  %2297 = vmatpush3.bf16.msra.mxu0 %v2296_v3  ;;  %v936_v58 = vld [vmem:[%s3622_s1 + $0x20] sm:$0xff] }
  0x75   : > { %2323 = vmatprep.subr.bf16.mxu0 %v2322_v8  ;;  %v2354_v60 = vpack.c.bf16 %v937_v59, %v936_v58  ;;  %v940_v3 = vld [vmem:[%s3622_s1 + $0x40] sm:$0xff]  ;;  %v1173_v58 = vld [vmem:[#allocation5 + $0x28] sm:$0xff] }
  0x76   : > { %v2362_v6 = vpack.c.bf16 %v941_v4, %v940_v3  ;;  %v1177_v3 = vld [vmem:[#allocation5 + $0x48] sm:$0xff] }
  0xe8   : > { %v510_v11 = vpop.xlane.xlu0 %509  ;;  %v516_v12 = vpop.xlane.xlu1 %515 }
  0xe9   : > { %v521_v13 = vmul.f32 0.010416667, %v510_v11  ;;  %v523_v14 = vmul.f32 0.010416667, %v516_v12  ;;  %v2346_v11 = vpack.c.bf16 %v933_v10, %v932_v9  ;;  %v943_v9 = vld [vmem:[%s3622_s1 + $0x58] sm:$0xff] }
  0xeb   : > { %v2981_v15 = vsub.f32 %v2958_v0, %v521_v13  ;;  %v2984_v16 = vsub.f32 %v2960_v1, %v523_v14  ;;  %2347 = vmatprep.subr.bf16.mxu1 %v2346_v11 }
  0xec   : > { %v513_v17 = vpop.xlane.xlu0 %512  ;;  %v519_v18 = vpop.xlane.xlu1 %518 }
  0xed   : > { %v522_v19 = vmul.f32 0.010416667, %v513_v17  ;;  %v524_v20 = vmul.f32 0.010416667, %v519_v18  ;;  %v529_v21 = vmul.f32 %v2981_v15, %v2981_v15  ;;  %v531_v22 = vmul.f32 %v2984_v16, %v2984_v16 }
  0xef   : > { %v2991_v23 = vsub.f32 %v2962_v2, %v522_v19  ;;  %v2994_v24 = vsub.f32 %v2968_v5, %v524_v20  ;;  %v533_v25 = vsel %vm507_vm0, %v529_v21, 0.0  ;;  %v539_v26 = vsel %vm507_vm0, %v531_v22, 0.0 }
  0xf0   : > { %534 = vadd.xlane.f32.xlu0 %v533_v25 }
  0xf1   : > { %v530_v27 = vmul.f32 %v2991_v23, %v2991_v23  ;;  %v532_v28 = vmul.f32 %v2994_v24, %v2994_v24 }
  0xf3   : > { %v536_v29 = vsel %vm507_vm0, %v530_v27, 0.0  ;;  %v542_v30 = vsel %vm507_vm0, %v532_v28, 0.0 }
  0xf4   : > { %540 = vadd.xlane.f32.xlu0 %v539_v26  ;;  %537 = vadd.xlane.f32.xlu1 %v536_v29 }
  0xf8   : > { %543 = vadd.xlane.f32.xlu1 %v542_v30 }
 0x17d   : > { %v535_v12 = vpop.xlane.xlu0 %534 }
 0x17e   : > { %v545_v13 = vmul.f32 0.010416667, %v535_v12  ;;  %v2722_v12 = vmov 1966171168  }
 0x180   : > { %v549_v14 = vadd.f32 1e-06, %v545_v13  ;;  %v885_v13 = vunpack.c.l.s4 %v2722_v12 }
 0x181   : > { %v538_v17 = vpop.xlane.xlu1 %537  ;;  %v541_v18 = vpop.xlane.xlu0 %540 }
 0x182   : > { %2551 = vrsqrt.f32 %v549_v14  ;;  %v546_v19 = vmul.f32 0.010416667, %v538_v17  ;;  %v547_v20 = vmul.f32 0.010416667, %v541_v18  ;;  %v887_v14 = vlaneseq }
 0x184   : > { %v550_v21 = vadd.f32 1e-06, %v546_v19  ;;  %v551_v22 = vadd.f32 1e-06, %v547_v20  ;;  %v886_v19 = vunpack.c.0.s8 %v885_v13  ;;  %v3169_v20 = vshrl.u32 %v887_v14, 7 }
 0x185   : > { %v544_v25 = vpop.xlane.xlu1 %543 }
 0x186   : > { %2553 = vrsqrt.f32 %v550_v21  ;;  %v548_v26 = vmul.f32 0.010416667, %v544_v25  ;;  %vm1043_vm5 = vcmp.lt.s32.totalorder %v3169_v20, 7 }
 0x187   : > { %2555 = vrsqrt.f32 %v551_v22  ;;  %v1907_v22 = vld [vmem:[%s3624_s3] ss:$0 sm:$0xff] }
 0x188   : > { %v552_v27 = vadd.f32 1e-06, %v548_v26 }
 0x18a   : > { %2557 = vrsqrt.f32 %v552_v27  ;;  %v889_v27 = vsub.s32 %v886_v19, %v3169_v20 }
 0x18c   : > { %v2552_v28 = vpop.eup %2551 }
 0x18d   : > { %v557_v29 = vmul.f32 %v2552_v28, %v2981_v15 }
 0x18f   : > { %2125 = vmatprep.mubr.msk.f32.mxu1 %vm507_vm0, %v557_v29  ;;  %v584_v34 = vrot.slane %v557_v29, 7 }
 0x190   : > { %v2554_v30 = vpop.eup %2553 }
 0x191   : > { %v2556_v31 = vpop.eup %2555  ;;  %v558_v32 = vmul.f32 %v2554_v30, %v2991_v23  ;;  %v781_v23 = vld [vmem:[%s3627_s6 + $0x10] sm:$0xff] }
 0x192   : > { %v559_v33 = vmul.f32 %v2556_v31, %v2984_v16  ;;  %v782_v16 = vld [vmem:[%s3627_s6 + $0x18] sm:$0xff]  ;;  %v3176_v31 = vsub.s32 0, %v3169_v20 }
 0x193   : > { %v585_v35 = vrot.slane %v558_v32, 6  ;;  %2126 = vmatmul.mubr.msk.f32.vlgmr.msra.gmra.mrb[0].mxu1 %vm507_vm0, %v558_v32  ;;  %v2326_v42 = vpack.c.bf16 %v782_v16, %v781_v23 }
 0x194   : > { %v2558_v37 = vpop.eup %2557  ;;  %2128 = vmatprep.mubr.msk.f32.mxu1 %vm507_vm0, %v559_v33  ;;  %v588_v38 = vrot.slane %v559_v33, 5  ;;  %2349 = vmatpush3.bf16.msra.mxu1 %v2346_v11 }
 0x195   : > { %v560_v15 = vmul.f32 %v2558_v37, %v2994_v24  ;;  %v587_v39 = vsel %vm586_vm2, %v585_v35, %v584_v34  ;;  %2351 = vmatprep.subr.bf16.mxu1 %v2350_v57 }
 0x196   : > { %v590_v41 = vsel %vm589_vm3, %v588_v38, %v587_v39 }
 0x197   : > { %2129 = vmatmul.mubr.msk.f32.gmra.mrb[2].mxu1 %vm507_vm0, %v560_v15  ;;  %v591_v40 = vrot.slane %v560_v15, 4 }
 0x198   : > { %2353 = vmatpush3.bf16.msra.mxu1 %v2350_v57  ;;  %v1172_v57 = vld [vmem:[#allocation5 + $0x20] sm:$0xff] }
 0x199   : > { %v593_v24 = vsel %vm592_vm4, %v591_v40, %v590_v41  ;;  %2355 = vmatprep.subr.bf16.mxu1 %v2354_v60  ;;  %v2377_v59 = vpack.c.bf16 %v1173_v58, %v1172_v57 }
 0x19a   : > { %2099 = vmatmul.mubr.msk.f32.vlgmr.msra.gmra.mrb[0].mxu0 %vm507_vm0, %v593_v24 }
 0x19b   : > { %2325 = vmatpush3.bf16.msra.mxu0 %v2322_v8  ;;  %2155 = vmatprep.mubr.msk.f32.mxu0 %vm507_vm0, %v557_v29  ;;  %v942_v8 = vld [vmem:[%s3622_s1 + $0x50] sm:$0xff] }
 0x19c   : > { %2327 = vmatprep.subr.bf16.mxu0 %v2326_v42  ;;  %2357 = vmatpush3.bf16.msra.mxu1 %v2354_v60  ;;  %v2366_v10 = vpack.c.bf16 %v943_v9, %v942_v8  ;;  %v1174_v60 = vld [vmem:[#allocation5 + $0x30] sm:$0xff]  ;;  %v1179_v8 = vld [vmem:[#allocation5 + $0x58] sm:$0xff] }
 0x19d   : > { %2359 = vmatprep.subr.bf16.mxu1 %v2358_v63  ;;  %v2380_v62 = vpack.c.bf16 %v1175_v61, %v1174_v60 }
 0x19f   : > { %2329 = vmatpush3.bf16.msra.mxu0 %v2326_v42 }
 0x1a0   : > { %2331 = vmatprep.subr.bf16.mxu0 %v2330_v45  ;;  %2361 = vmatpush3.bf16.msra.mxu1 %v2358_v63  ;;  %v1176_v63 = vld [vmem:[#allocation5 + $0x40] sm:$0xff] }
 0x1a1   : > { %2363 = vmatprep.subr.bf16.mxu1 %v2362_v6  ;;  %v2383_v4 = vpack.c.bf16 %v1177_v3, %v1176_v63 }
 0x1a3   : > { %2333 = vmatpush3.bf16.msra.mxu0 %v2330_v45 }
 0x1a4   : > { %2335 = vmatprep.subr.bf16.mxu0 %v2334_v48  ;;  %2365 = vmatpush3.bf16.msra.mxu1 %v2362_v6  ;;  %v1178_v6 = vld [vmem:[#allocation5 + $0x50] sm:$0xff] }
 0x1a5   : > { %2367 = vmatprep.subr.bf16.mxu1 %v2366_v10  ;;  %v2386_v9 = vpack.c.bf16 %v1179_v8, %v1178_v6 }
 0x1a7   : > { %2337 = vmatpush3.bf16.msra.mxu0 %v2334_v48 }
 0x1a8   : > { %2339 = vmatprep.subr.bf16.mxu0 %v2338_v51  ;;  %2369 = vmatpush3.bf16.msra.mxu1 %v2366_v10 }
 0x1ab   : > { %2341 = vmatpush3.bf16.msra.mxu0 %v2338_v51  ;;  %v1168_v51 = vld [vmem:[#allocation5] sm:$0xff] }
 0x1ac   : > { %2343 = vmatprep.subr.bf16.mxu0 %v2342_v54  ;;  %v2371_v53 = vpack.c.bf16 %v1169_v52, %v1168_v51 }
 0x1af   : > { %2345 = vmatpush3.bf16.msra.mxu0 %v2342_v54  ;;  %v1170_v54 = vld [vmem:[#allocation5 + $0x10] sm:$0xff] }
 0x1b0   : > { %2370 = vmatprep.subr.bf16.mxu0 %v2719_v36  ;;  %v2374_v56 = vpack.c.bf16 %v1171_v55, %v1170_v54 }
 0x1b2   : > { %2156 = vmatmul.mubr.msk.f32.vlgmr.msra.gmra.mrb[2].mxu0 %vm507_vm0, %v558_v32  ;;  %v1909_v32 = vld [vmem:[%s3626_s5] ss:$0 sm:$0xff] }
 0x1b3   : > { %2158 = vmatprep.mubr.msk.f32.mxu0 %vm507_vm0, %v559_v33  ;;  %2372 = vmatpush3.bf16.msra.mxu0 %v2371_v53 }
 0x1b4   : > { %2373 = vmatprep.subr.bf16.mxu0 %v2719_v36 }
 0x1b6   : > { %2159 = vmatmul.mubr.msk.f32.gmra.mrb[4].mxu0 %vm507_vm0, %v560_v15 }
 0x1b7   : > { %2215 = vmatprep.mubr.msk.f32.mxu0 %vm2720_vm1, %v2721_v7  ;;  %2375 = vmatpush3.bf16.msra.mxu0 %v2374_v56 }
 0x1b8   : > { %2376 = vmatprep.subr.bf16.mxu0 %v2719_v36 }
 0x1bb   : > { %2378 = vmatpush3.bf16.msra.mxu0 %v2377_v59 }
 0x1bc   : > { %2379 = vmatprep.subr.bf16.mxu0 %v2719_v36 }
 0x1bf   : > { %2381 = vmatpush3.bf16.msra.mxu0 %v2380_v62 }
 0x1c0   : > { %2382 = vmatprep.subr.bf16.mxu0 %v2719_v36 }
 0x1c3   : > { %2384 = vmatpush3.bf16.msra.mxu0 %v2383_v4 }
 0x1c4   : > { %2385 = vmatprep.subr.bf16.mxu0 %v2719_v36 }
 0x1c7   : > { %2387 = vmatpush3.bf16.msra.mxu0 %v2386_v9 }
 0x1c8   : > { %2412 = vmatprep.subr.bf16.mxu0 %v2719_v36 }
 0x266   : > { %v2127_v11 = vpop.f32.mrb[0].mxu1 }
 0x267   : > { %v760_v17 = vpop.f32.mrb[1].mxu1  ;;  %v766_v39 = vadd.f32 %v2127_v11, %v1909_v32 }
 0x268   : > { %v761_v35 = vadd.f32 %v1909_v32, %v760_v17 }
 0x26a   : > { %v2130_v18 = vpop.f32.mrb[2].mxu1 }
 0x26b   : > { %v770_v21 = vpop.f32.mrb[3].mxu1  ;;  %v776_v24 = vadd.f32 %v2130_v18, %v1909_v32 }
 0x26c   : > { %v771_v23 = vadd.f32 %v1909_v32, %v770_v21 }
 0x26d   : > { %v662_v25 = vpop.f32.mrb[0].mxu0 }
 0x26e   : > { %v663_v26 = vadd.f32 %v1907_v22, %v662_v25  ;;  %v2100_v28 = vpop.f32.mrb[1].mxu0 }
 0x270   : > { %v666_v29 = vmul.f32 0.14433756, %v663_v26 }
 0x272   : > { %v890_v30 = vrot.slane %v666_v29, %v889_v27 }
 0x274   : > { %v891_v33 = vcombine.high %v890_v30, %v890_v30  ;;  %v898_v34 = vrot.slane %v890_v30, %v889_v27 }
 0x276   : > { %v905_v37 = vrot.slane %v891_v33, %v889_v27  ;;  %v906_v38 = vcombine.high %v898_v34, %v898_v34  ;;  %v911_v15 = vrot.slane %v898_v34, %v3176_v31 }
 0x278   : > { %v907_v16 = vcombine.high %v905_v37, %v905_v37  ;;  %v915_v40 = vrot.slane %v905_v37, %v3176_v31  ;;  %v919_v41 = vrot.slane %v906_v38, %v3176_v31  ;;  %v928_v42 = vmul.f32 %v911_v15, %v761_v35 }
 0x27a   : > { %v929_v43 = vmul.f32 %v915_v40, %v766_v39  ;;  %2185 = vmatprep.mubr.msk.f32.mxu1 %vm507_vm0, %v928_v42  ;;  %v930_v44 = vmul.f32 %v919_v41, %v771_v23  ;;  %v923_v45 = vrot.slane %v907_v16, %v3176_v31 }
 0x27c   : > { %2186 = vmatmul.mubr.msk.f32.vlgmr.msra.gmra.mrb[4].mxu1 %vm507_vm0, %v929_v43  ;;  %v931_v46 = vmul.f32 %v923_v45, %v776_v24 }
 0x27d   : > { %2188 = vmatprep.mubr.msk.f32.mxu1 %vm507_vm0, %v930_v44 }
 0x280   : > { %2189 = vmatmul.mubr.msk.f32.gmra.mrb[6].mxu1 %vm507_vm0, %v931_v46 }
 0x281   : > { %1483 = vmatprep.mubr.f32.mxu1 %v2721_v7 }
 0x285   : > { %v3190_v47 = vpop.f32.mrb[2].mxu0 }
 0x286   : > { %v3192_v48 = vpop.f32.mrb[3].mxu0 }
 0x289   : > { %v3194_v49 = vpop.f32.mrb[4].mxu0 }
 0x28a   : > { %v3196_v50 = vpop.f32.mrb[5].mxu0 }
 0x34f   : > { %v2187_v10 = vpop.f32.mrb[4].mxu1 }
 0x350   : > { %v1045_v11 = vsel %vm1043_vm5, %v2187_v10, -1e+30  ;;  %v1022_v12 = vpop.f32.mrb[5].mxu1 }
 0x351   : > { %v1055_v13 = vsel %vm507_vm0, %v1045_v11, -inf  ;;  %v1044_v14 = vsel %vm1043_vm5, %v1022_v12, -1e+30 }
 0x352   : > { %v1056_v17 = vrot.slane %v1055_v13, 4  ;;  %v1048_v18 = vsel %vm507_vm0, %v1044_v14, -inf }
 0x353   : > { %v1049_v19 = vrot.slane %v1048_v18, 4  ;;  %v2190_v21 = vpop.f32.mrb[6].mxu1 }
 0x354   : > { %v1057_v22 = vmax.f32 %v1055_v13, %v1056_v17  ;;  %v1047_v25 = vsel %vm1043_vm5, %v2190_v21, -1e+30  ;;  %v1032_v26 = vpop.f32.mrb[7].mxu1 }
 0x355   : > { %v1050_v27 = vmax.f32 %v1048_v18, %v1049_v19  ;;  %v1069_v28 = vsel %vm507_vm0, %v1047_v25, -inf  ;;  %v1046_v29 = vsel %vm1043_vm5, %v1032_v26, -1e+30 }
 0x356   : > { %v1058_v30 = vrot.slane %v1057_v22, 2  ;;  %v1070_v32 = vrot.slane %v1069_v28, 4  ;;  %v1062_v33 = vsel %vm507_vm0, %v1046_v29, -inf }
 0x357   : > { %v1051_v34 = vrot.slane %v1050_v27, 2  ;;  %v1063_v35 = vrot.slane %v1062_v33, 4 }
 0x358   : > { %v1059_v37 = vmax.f32 %v1057_v22, %v1058_v30  ;;  %v1071_v38 = vmax.f32 %v1069_v28, %v1070_v32 }
 0x359   : > { %v1052_v15 = vmax.f32 %v1050_v27, %v1051_v34  ;;  %v1064_v39 = vmax.f32 %v1062_v33, %v1063_v35 }
 0x35a   : > { %v1060_v23 = vrot.slane %v1059_v37, 1  ;;  %v1072_v16 = vrot.slane %v1071_v38, 2 }
 0x35b   : > { %v1053_v40 = vrot.slane %v1052_v15, 1  ;;  %v1065_v41 = vrot.slane %v1064_v39, 2 }
 0x35c   : > { %v1061_v42 = vmax.f32 %v1059_v37, %v1060_v23  ;;  %v1073_v24 = vmax.f32 %v1071_v38, %v1072_v16 }
 0x35d   : > { %v1054_v43 = vmax.f32 %v1052_v15, %v1053_v40  ;;  %v1066_v44 = vmax.f32 %v1064_v39, %v1065_v41 }
 0x35e   : > { %v1077_v45 = vsub.f32 %v1045_v11, %v1061_v42  ;;  %v1074_v46 = vrot.slane %v1073_v24, 1 }
 0x35f   : > { %v1076_v51 = vsub.f32 %v1044_v14, %v1054_v43  ;;  %v1067_v52 = vrot.slane %v1066_v44, 1  ;;  %v1914_v43 = vld [vmem:[%s3628_s7] ss:$0 sm:$0xff] }
 0x360   : > { %v1082_v53 = vmul.f32 1.442695, %v1077_v45  ;;  %v1075_v54 = vmax.f32 %v1073_v24, %v1074_v46 }
 0x361   : > { %v1080_v55 = vmul.f32 1.442695, %v1076_v51  ;;  %v1068_v56 = vmax.f32 %v1066_v44, %v1067_v52 }
 0x362   : > { %2559 = vpow2.f32 %v1082_v53  ;;  %v1079_v57 = vsub.f32 %v1047_v25, %v1075_v54  ;;  %v870_v54 = vadd.f32 %v3190_v47, %v1914_v43 }
 0x363   : > { %2561 = vpow2.f32 %v1080_v55  ;;  %v1078_v58 = vsub.f32 %v1046_v29, %v1068_v56 }
 0x364   : > { %v1086_v59 = vmul.f32 1.442695, %v1079_v57  ;;  %v865_v57 = vadd.f32 %v1914_v43, %v3192_v48 }
 0x365   : > { %v1084_v60 = vmul.f32 1.442695, %v1078_v58 }
 0x366   : > { %2563 = vpow2.f32 %v1086_v59 }
 0x367   : > { %2565 = vpow2.f32 %v1084_v60 }
 0x36c   : > { %v2560_v61 = vpop.eup %2559 }
 0x36d   : > { %v2562_v62 = vpop.eup %2561  ;;  %v1095_v63 = vsel %vm507_vm0, %v2560_v61, 0.0 }
 0x36e   : > { %v1096_v3 = vrot.slane %v1095_v63, 4  ;;  %v1088_v4 = vsel %vm507_vm0, %v2562_v62, 0.0 }
 0x36f   : > { %v1089_v6 = vrot.slane %v1088_v4, 4 }
 0x370   : > { %v2564_v8 = vpop.eup %2563  ;;  %v1097_v9 = vadd.f32 %v1096_v3, %v1095_v63 }
 0x371   : > { %v2566_v10 = vpop.eup %2565  ;;  %v1090_v11 = vadd.f32 %v1089_v6, %v1088_v4  ;;  %v1109_v12 = vsel %vm507_vm0, %v2564_v8, 0.0  ;;  %v880_v6 = vadd.f32 %v3194_v49, %v1914_v43 }
 0x372   : > { %v1098_v13 = vrot.slane %v1097_v9, 2  ;;  %v1110_v14 = vrot.slane %v1109_v12, 4  ;;  %v1102_v17 = vsel %vm507_vm0, %v2566_v10, 0.0 }
 0x373   : > { %v1091_v18 = vrot.slane %v1090_v11, 2  ;;  %v1103_v19 = vrot.slane %v1102_v17, 4 }
 0x374   : > { %v1099_v21 = vadd.f32 %v1098_v13, %v1097_v9  ;;  %v1111_v22 = vadd.f32 %v1110_v14, %v1109_v12  ;;  %v875_v12 = vadd.f32 %v1914_v43, %v3196_v50 }
 0x375   : > { %v1092_v25 = vadd.f32 %v1091_v18, %v1090_v11  ;;  %v1104_v26 = vadd.f32 %v1103_v19, %v1102_v17 }
 0x376   : > { %v1100_v27 = vrot.slane %v1099_v21, 1  ;;  %v1112_v28 = vrot.slane %v1111_v22, 2 }
 0x377   : > { %v1093_v29 = vrot.slane %v1092_v25, 1  ;;  %v1105_v30 = vrot.slane %v1104_v26, 2 }
 0x378   : > { %v1101_v32 = vadd.f32 %v1100_v27, %v1099_v21  ;;  %v1113_v33 = vadd.f32 %v1112_v28, %v1111_v22 }
 0x379   : > { %v1094_v34 = vadd.f32 %v1093_v29, %v1092_v25  ;;  %v1106_v35 = vadd.f32 %v1105_v30, %v1104_v26 }
 0x37a   : > { %2567 = vrcp.f32 %v1101_v32  ;;  %v1114_v37 = vrot.slane %v1113_v33, 1 }
 0x37b   : > { %2569 = vrcp.f32 %v1094_v34  ;;  %v1107_v38 = vrot.slane %v1106_v35, 1 }
 0x37c   : > { %v1115_v15 = vadd.f32 %v1114_v37, %v1113_v33 }
 0x37d   : > { %v1108_v39 = vadd.f32 %v1107_v38, %v1106_v35 }
 0x37e   : > { %2571 = vrcp.f32 %v1115_v15 }
 0x37f   : > { %2573 = vrcp.f32 %v1108_v39 }
 0x384   : > { %v2568_v23 = vpop.eup %2567 }
 0x385   : > { %v2570_v16 = vpop.eup %2569  ;;  %v1121_v40 = vmul.f32 %v2568_v23, %v1101_v32 }
 0x386   : > { %v1120_v41 = vmul.f32 %v2570_v16, %v1094_v34 }
 0x387   : > { %v1125_v42 = vsub.f32 2.0, %v1121_v40 }
 0x388   : > { %v2572_v24 = vpop.eup %2571  ;;  %v1124_v44 = vsub.f32 2.0, %v1120_v41 }
 0x389   : > { %v2574_v45 = vpop.eup %2573  ;;  %v1129_v46 = vmul.f32 %v2568_v23, %v1125_v42  ;;  %v1123_v51 = vmul.f32 %v2572_v24, %v1115_v15  ;;  %v1923_v42 = vld [vmem:[%s3630_s9] ss:$0 sm:$0xff] }
 0x38a   : > { %v1128_v52 = vmul.f32 %v2570_v16, %v1124_v44  ;;  %v1122_v53 = vmul.f32 %v2574_v45, %v1108_v39 }
 0x38b   : > { %v1133_v55 = vmul.f32 %v2560_v61, %v1129_v46  ;;  %v1127_v56 = vsub.f32 2.0, %v1123_v51 }
 0x38c   : > { %v1132_v58 = vmul.f32 %v2562_v62, %v1128_v52  ;;  %v1126_v59 = vsub.f32 2.0, %v1122_v53 }
 0x38d   : > { %v1137_v60 = vmul.f32 %v1133_v55, %v870_v54  ;;  %v1131_v63 = vmul.f32 %v2572_v24, %v1127_v56 }
 0x38e   : > { %v1136_v3 = vmul.f32 %v1132_v58, %v865_v57  ;;  %v1130_v4 = vmul.f32 %v2574_v45, %v1126_v59 }
 0x38f   : > { %v1147_v9 = vsel %vm507_vm0, %v1137_v60, 0.0  ;;  %v1135_v11 = vmul.f32 %v2564_v8, %v1131_v63 }
 0x390   : > { %v1148_v13 = vrot.slane %v1147_v9, 4  ;;  %v1140_v47 = vsel %vm507_vm0, %v1136_v3, 0.0  ;;  %v1134_v61 = vmul.f32 %v2566_v10, %v1130_v4 }
 0x391   : > { %v1141_v14 = vrot.slane %v1140_v47, 4  ;;  %v1139_v17 = vmul.f32 %v1135_v11, %v880_v6 }
 0x392   : > { %v1149_v48 = vadd.f32 %v1148_v13, %v1147_v9  ;;  %v1138_v62 = vmul.f32 %v1134_v61, %v875_v12 }
 0x393   : > { %v1142_v18 = vadd.f32 %v1141_v14, %v1140_v47  ;;  %v1161_v19 = vsel %vm507_vm0, %v1139_v17, 0.0 }
 0x394   : > { %v1150_v21 = vrot.slane %v1149_v48, 2  ;;  %v1162_v22 = vrot.slane %v1161_v19, 4  ;;  %v1154_v49 = vsel %vm507_vm0, %v1138_v62, 0.0 }
 0x395   : > { %v1143_v25 = vrot.slane %v1142_v18, 2  ;;  %v1155_v26 = vrot.slane %v1154_v49, 4 }
 0x396   : > { %v1151_v8 = vadd.f32 %v1150_v21, %v1149_v48  ;;  %v1163_v27 = vadd.f32 %v1162_v22, %v1161_v19 }
 0x397   : > { %v1156_v50 = vadd.f32 %v1155_v26, %v1154_v49  ;;  %v1144_v28 = vadd.f32 %v1143_v25, %v1142_v18 }
 0x398   : > { %v1152_v29 = vrot.slane %v1151_v8, 1  ;;  %v1164_v30 = vrot.slane %v1163_v27, 2 }
 0x399   : > { %v1145_v10 = vrot.slane %v1144_v28, 1  ;;  %v1157_v32 = vrot.slane %v1156_v50, 2 }
 0x39a   : > { %v1153_v33 = vadd.f32 %v1152_v29, %v1151_v8  ;;  %v1165_v34 = vadd.f32 %v1164_v30, %v1163_v27  ;;  %v1354_v8 = vld [vmem:[%s3631_s10 + $0x8] sm:$0xff]  ;;  %v1357_v27 = vld [vmem:[%s3631_s10 + $0x20] sm:$0xff]  ;;  %v1356_v29 = vld [vmem:[%s3631_s10 + $0x18] sm:$0xff] }
 0x39b   : > { %v1146_v35 = vadd.f32 %v1145_v10, %v1144_v28  ;;  %v1158_v37 = vadd.f32 %v1157_v32, %v1156_v50  ;;  %v2388_v50 = vpack.c.bf16 %v1357_v27, %v1354_v8  ;;  %v1353_v28 = vld [vmem:[%s3631_s10] sm:$0xff]  ;;  %v1355_v30 = vld [vmem:[%s3631_s10 + $0x10] sm:$0xff]  ;;  %v1358_v32 = vld [vmem:[%s3631_s10 + $0x28] sm:$0xff] }
 0x39c   : > { %v1166_v38 = vrot.slane %v1165_v34, 1  ;;  %v2390_v10 = vpack.c.bf16 %v1356_v29, %v1353_v28  ;;  %v1604_v28 = vld [vmem:[%s3666_s23 + $0x88] sm:$0xff] }
 0x39d   : > { %v1159_v15 = vrot.slane %v1158_v37, 1  ;;  %v1191_v39 = vsel %vm586_vm2, %v1153_v33, %v1146_v35  ;;  %2389 = vmatprep.subr.bf16.mxu1 %v2388_v50  ;;  %v2413_v33 = vpack.c.bf16 %v1358_v32, %v1355_v30  ;;  %v1363_v35 = vld [vmem:[%s3631_s10 + $0x50] sm:$0xff]  ;;  %v1603_v50 = vld [vmem:[%s3665_s29 + $0x80] sm:$0xff]  ;;  %s3567_s29 = scalar_lea.hbm %s3669_s22, %s1934_s14 }
 0x39e   : > { %v1167_v16 = vadd.f32 %v1166_v38, %v1165_v34  ;;  %2391 = vmatpush1.bf16.msra.mxu1 %v2390_v10  ;;  %v1360_v34 = vld [vmem:[%s3631_s10 + $0x38] sm:$0xff]  ;;  %v1359_v38 = vld [vmem:[%s3631_s10 + $0x30] sm:$0xff]  ;;  %v2430_v29 = vpack.c.bf16 %v1604_v28, %v1603_v50  ;;  %v1627_v50 = vld [vmem:[%s3666_s23 + $0x140] sm:$0xff] }
 0x39f   : > { %v1160_v23 = vadd.f32 %v1159_v15, %v1158_v37  ;;  %v2392_v37 = vpack.c.bf16 %v1363_v35, %v1360_v34  ;;  %v1362_v15 = vld [vmem:[%s3631_s10 + $0x48] sm:$0xff] }
 0x3a1   : > { %v1192_v40 = vsel %vm589_vm3, %v1160_v23, %v1191_v39  ;;  %v1361_v39 = vld [vmem:[%s3631_s10 + $0x40] sm:$0xff]  ;;  %v2394_v23 = vpack.c.bf16 %v1362_v15, %v1359_v38  ;;  %2393 = vmatprep.subr.bf16.mxu1 %v2392_v37 }
 0x3a2   : > { %v1193_v41 = vsel %vm592_vm4, %v1167_v16, %v1192_v40  ;;  %v1364_v16 = vld [vmem:[%s3631_s10 + $0x58] sm:$0xff] }
 0x3a3   : > { %2216 = vmatmul.mubr.msk.f32.vlgmr.msra.gmra.mrb[6].mxu0 %vm507_vm0, %v1193_v41  ;;  %v2416_v40 = vpack.c.bf16 %v1364_v16, %v1361_v39  ;;  %2395 = vmatpush1.bf16.msra.mxu1 %v2394_v23  ;;  %v1366_v41 = vld [vmem:[%s3631_s10 + $0x68] sm:$0xff] }
 0x3a4   : > { %2242 = vmatprep.mubr.msk.f32.mxu0 %vm2720_vm1, %v2721_v7  ;;  %2414 = vmatpush3.bf16.msra.mxu0 %v2413_v33 }
 0x3a5   : > { %2415 = vmatprep.subr.bf16.mxu0 %v2719_v36 }
 0x3a8   : > { %2417 = vmatpush3.bf16.msra.mxu0 %v2416_v40 }
 0x3a9   : > { %2418 = vmatprep.subr.bf16.mxu0 %v2719_v36 }
 0x476   : > { %v1262_v24 = vpop.f32.mrb[6].mxu0 }
 0x477   : > { %v1263_v43 = vadd.f32 %v1923_v42, %v1262_v24  ;;  %v2217_v44 = vpop.f32.mrb[7].mxu0  ;;  %v1369_v42 = vld [vmem:[%s3631_s10 + $0x80] sm:$0xff] }
 0x478   : > { %v2396_v24 = vpack.c.bf16 %v1369_v42, %v1366_v41  ;;  %v1368_v44 = vld [vmem:[%s3631_s10 + $0x78] sm:$0xff] }
 0x479   : > { %v1268_v45 = vrot.slane %v1263_v43, 2  ;;  %v1269_v46 = vrot.slane %v1263_v43, 3  ;;  %v1270_v51 = vrot.slane %v1263_v43, 4  ;;  %v1267_v52 = vrot.slane %v1263_v43, 1  ;;  %v1365_v43 = vld [vmem:[%s3631_s10 + $0x60] sm:$0xff] }
 0x47a   : > { %2397 = vmatprep.subr.bf16.mxu1 %v2396_v24  ;;  %v1619_v24 = vld [vmem:[%s3666_s23 + $0x100] sm:$0xff] }
 0x47b   : > { %v3234_v53 = vadd.f32 %v1268_v45, %v2962_v2  ;;  %v3237_v54 = vadd.f32 %v1269_v46, %v2960_v1  ;;  %v3240_v55 = vadd.f32 %v1267_v52, %v2958_v0  ;;  %v3243_v56 = vadd.f32 %v1270_v51, %v2968_v5  ;;  %v1367_v45 = vld [vmem:[%s3631_s10 + $0x70] sm:$0xff]  ;;  %v1370_v51 = vld [vmem:[%s3631_s10 + $0x88] sm:$0xff]  ;;  %v1372_v52 = vld [vmem:[%s3631_s10 + $0x98] sm:$0xff] }
 0x47c   : > { %v2398_v46 = vpack.c.bf16 %v1368_v44, %v1365_v43  ;;  %v1620_v43 = vld [vmem:[%s3666_s23 + $0x108] sm:$0xff] }
 0x47d   : > { %v1291_v57 = vsel %vm1290_vm6, %v3240_v55, 0.0  ;;  %v1283_v58 = vrot.slane %v3234_v53, 7  ;;  %v1284_v59 = vrot.slane %v3237_v54, 6  ;;  %v1286_v60 = vrot.slane %v3243_v56, 5 }
 0x47e   : > { %1292 = vadd.xlane.f32.xlu1 %v1291_v57  ;;  %v1375_v57 = vld [vmem:[%s3631_s10 + $0xb0] sm:$0xff]  ;;  %2399 = vmatpush1.bf16.msra.mxu1 %v2398_v46 }
 0x47f   : > { %v1285_v1 = vsel %vm586_vm2, %v1284_v59, %v1283_v58  ;;  %v2419_v58 = vpack.c.bf16 %v1370_v51, %v1367_v45  ;;  %v2400_v59 = vpack.c.bf16 %v1375_v57, %v1372_v52  ;;  %v2463_v51 = vpack.c.bf16 %v1620_v43, %v1619_v24  ;;  %v1615_v24 = vld [vmem:[%s3666_s23 + $0xe0] sm:$0xff]  ;;  %v1616_v43 = vld [vmem:[%s3666_s23 + $0xe8] sm:$0xff] }
 0x480   : > { %v1287_v2 = vsel %vm589_vm3, %v1286_v60, %v1285_v1  ;;  %v1371_v60 = vld [vmem:[%s3631_s10 + $0x90] sm:$0xff]  ;;  %v1374_v1 = vld [vmem:[%s3631_s10 + $0xa8] sm:$0xff] }
 0x481   : > { %v1295_v0 = vsel %vm1294_vm7, %v1287_v2, 0.0  ;;  %v1373_v2 = vld [vmem:[%s3631_s10 + $0xa0] sm:$0xff]  ;;  %2420 = vmatpush3.bf16.msra.mxu0 %v2419_v58  ;;  %2401 = vmatprep.subr.bf16.mxu1 %v2400_v59  ;;  %v1621_v59 = vld [vmem:[%s3666_s23 + $0x110] sm:$0xff] }
 0x482   : > { %1296 = vadd.xlane.f32.xlu0 %v1295_v0  ;;  %v2402_v0 = vpack.c.bf16 %v1374_v1, %v1371_v60  ;;  %2421 = vmatprep.subr.bf16.mxu0 %v2719_v36  ;;  %v1622_v60 = vld [vmem:[%s3666_s23 + $0x118] sm:$0xff] }
 0x483   : > { %v2466_v1 = vpack.c.bf16 %v1622_v60, %v1621_v59 }
 0x484   : > { %2403 = vmatpush1.bf16.msra.mxu1 %v2402_v0  ;;  %v1606_v0 = vld [vmem:[%s3666_s23 + $0x98] sm:$0xff] }
 0x50b   : > { %v1293_v5 = vpop.xlane.xlu1 %1292 }
 0x50c   : > { %v1298_v63 = vmul.f32 0.010416667, %v1293_v5  ;;  %v1376_v5 = vld [vmem:[%s3631_s10 + $0xb8] sm:$0xff] }
 0x50e   : > { %v3254_v3 = vsub.f32 %v3240_v55, %v1298_v63  ;;  %v1378_v63 = vld [vmem:[%s3631_s10 + $0xc8] sm:$0xff] }
 0x50f   : > { %v1297_v4 = vpop.xlane.xlu0 %1296 }
 0x510   : > { %v1299_v6 = vmul.f32 0.010416667, %v1297_v4  ;;  %v1313_v9 = vmul.f32 %v3254_v3, %v3254_v3  ;;  %v1381_v4 = vld [vmem:[%s3631_s10 + $0xe0] sm:$0xff] }
 0x512   : > { %v1302_v11 = vrot.slane %v1299_v6, 1  ;;  %v1303_v12 = vrot.slane %v1299_v6, 2  ;;  %v1304_v13 = vrot.slane %v1299_v6, 3  ;;  %v1328_v47 = vsel %vm1290_vm6, %v1313_v9, 0.0 }
 0x513   : > { %1329 = vadd.xlane.f32.xlu1 %v1328_v47  ;;  %v2422_v6 = vpack.c.bf16 %v1376_v5, %v1373_v2  ;;  %v2404_v9 = vpack.c.bf16 %v1381_v4, %v1378_v63  ;;  %v1382_v47 = vld [vmem:[%s3631_s10 + $0xe8] sm:$0xff]  ;;  %v1605_v2 = vld [vmem:[%s3666_s23 + $0x90] sm:$0xff]  ;;  %v1590_v63 = vld [vmem:[%s3666_s23 + $0x18] sm:$0xff] }
 0x514   : > { %v3260_v61 = vsub.f32 %v3234_v53, %v1302_v11  ;;  %v3263_v14 = vsub.f32 %v3237_v54, %v1303_v12  ;;  %v3266_v17 = vsub.f32 %v3243_v56, %v1304_v13  ;;  %v1377_v11 = vld [vmem:[%s3631_s10 + $0xc0] sm:$0xff]  ;;  %v1380_v12 = vld [vmem:[%s3631_s10 + $0xd8] sm:$0xff]  ;;  %v1379_v13 = vld [vmem:[%s3631_s10 + $0xd0] sm:$0xff]  ;;  %v2434_v5 = vpack.c.bf16 %v1606_v0, %v1605_v2 }
 0x515   : > { %2423 = vmatpush3.bf16.msra.mxu0 %v2422_v6  ;;  %2405 = vmatprep.subr.bf16.mxu1 %v2404_v9  ;;  %v1623_v6 = vld [vmem:[%s3666_s23 + $0x120] sm:$0xff]  ;;  %v1624_v9 = vld [vmem:[%s3666_s23 + $0x128] sm:$0xff]  ;;  %v1602_v2 = vld [vmem:[%s3666_s23 + $0x78] sm:$0xff] }
 0x516   : > { %v1314_v48 = vmul.f32 %v3260_v61, %v3260_v61  ;;  %v1315_v62 = vmul.f32 %v3263_v14, %v3263_v14  ;;  %v1316_v18 = vmul.f32 %v3266_v17, %v3266_v17  ;;  %2424 = vmatprep.subr.bf16.mxu0 %v2719_v36 }
 0x518   : > { %v1321_v19 = vrot.slane %v1314_v48, 7  ;;  %v1322_v21 = vrot.slane %v1315_v62, 6  ;;  %v1324_v22 = vrot.slane %v1316_v18, 5  ;;  %v1384_v48 = vld [vmem:[%s3631_s10 + $0xf8] sm:$0xff]  ;;  %v1387_v62 = vld [vmem:[%s3631_s10 + $0x110] sm:$0xff]  ;;  %v2406_v18 = vpack.c.bf16 %v1380_v12, %v1377_v11  ;;  %v1607_v12 = vld [vmem:[%s3666_s23 + $0xa0] sm:$0xff] }
 0x519   : > { %v2469_v11 = vpack.c.bf16 %v1624_v9, %v1623_v6 }
 0x51a   : > { %v1323_v49 = vsel %vm586_vm2, %v1322_v21, %v1321_v19  ;;  %v2425_v19 = vpack.c.bf16 %v1382_v47, %v1379_v13  ;;  %v2408_v21 = vpack.c.bf16 %v1387_v62, %v1384_v48  ;;  %2407 = vmatpush1.bf16.msra.mxu1 %v2406_v18  ;;  %v1608_v13 = vld [vmem:[%s3666_s23 + $0xa8] sm:$0xff]  ;;  %v1591_v48 = vld [vmem:[%s3666_s23 + $0x20] sm:$0xff] }
 0x51b   : > { %v1325_v25 = vsel %vm589_vm3, %v1324_v22, %v1323_v49  ;;  %v1383_v22 = vld [vmem:[%s3631_s10 + $0xf0] sm:$0xff]  ;;  %v1386_v49 = vld [vmem:[%s3631_s10 + $0x108] sm:$0xff]  ;;  %v2438_v47 = vpack.c.bf16 %v1608_v13, %v1607_v12 }
 0x51c   : > { %v1331_v26 = vsel %vm1294_vm7, %v1325_v25, 0.0  ;;  %v1385_v25 = vld [vmem:[%s3631_s10 + $0x100] sm:$0xff]  ;;  %v2410_v8 = vpack.c.bf16 %v1386_v49, %v1383_v22  ;;  %2426 = vmatpush3.bf16.msra.mxu0 %v2425_v19  ;;  %2409 = vmatprep.subr.bf16.mxu1 %v2408_v21  ;;  %v1592_v62 = vld [vmem:[%s3666_s23 + $0x28] sm:$0xff]  ;;  %v1625_v19 = vld [vmem:[%s3666_s23 + $0x130] sm:$0xff] }
 0x51d   : > { %1332 = vadd.xlane.f32.xlu0 %v1331_v26  ;;  %v1388_v26 = vld [vmem:[%s3631_s10 + $0x118] sm:$0xff]  ;;  %2427 = vmatprep.subr.bf16.mxu0 %v2719_v36  ;;  %v2440_v18 = vpack.c.bf16 %v1592_v62, %v1591_v48  ;;  %v1609_v49 = vld [vmem:[%s3666_s23 + $0xb0] sm:$0xff] }
 0x51e   : > { %v2428_v27 = vpack.c.bf16 %v1388_v26, %v1385_v25  ;;  %2411 = vmatpush1.bf16.msra.mxu1 %v2410_v8  ;;  %v1626_v21 = vld [vmem:[%s3666_s23 + $0x138] sm:$0xff]  ;;  %v1593_v8 = vld [vmem:[%s3666_s23 + $0x30] sm:$0xff] }
 0x51f   : > { %2431 = vmatprep.subr.bf16.mxu1 %v2430_v29  ;;  %v2472_v22 = vpack.c.bf16 %v1626_v21, %v1625_v19  ;;  %v1610_v25 = vld [vmem:[%s3666_s23 + $0xb8] sm:$0xff]  ;;  %v1628_v29 = vld [vmem:[%s3666_s23 + $0x148] sm:$0xff] }
 0x520   : > { %2429 = vmatpush3.bf16.msra.mxu0 %v2428_v27  ;;  %v2442_v26 = vpack.c.bf16 %v1610_v25, %v1609_v49  ;;  %v1594_v27 = vld [vmem:[%s3666_s23 + $0x38] sm:$0xff] }
 0x521   : > { %2462 = vmatprep.subr.bf16.mxu0 %v2719_v36  ;;  %v2444_v28 = vpack.c.bf16 %v1594_v27, %v1593_v8 }
 0x5a0   : > { %v1330_v30 = vpop.xlane.xlu1 %1329 }
 0x5a1   : > { %v1334_v10 = vmul.f32 0.010416667, %v1330_v30  ;;  %v1611_v30 = vld [vmem:[%s3666_s23 + $0xc0] sm:$0xff] }
 0x5a3   : > { %v1336_v32 = vadd.f32 1e-06, %v1334_v10  ;;  %v1612_v10 = vld [vmem:[%s3666_s23 + $0xc8] sm:$0xff] }
 0x5a5   : > { %2575 = vrsqrt.f32 %v1336_v32  ;;  %v2475_v32 = vpack.c.bf16 %v1628_v29, %v1627_v50 }
 0x5aa   : > { %v1333_v33 = vpop.xlane.xlu0 %1332 }
 0x5ab   : > { %v1335_v34 = vmul.f32 0.010416667, %v1333_v33  ;;  %v2446_v33 = vpack.c.bf16 %v1612_v10, %v1611_v30 }
 0x5ad   : > { %v1337_v35 = vadd.f32 1e-06, %v1335_v34  ;;  %v1595_v34 = vld [vmem:[%s3666_s23 + $0x40] sm:$0xff] }
 0x5af   : > { %2577 = vrsqrt.f32 %v1337_v35  ;;  %v2576_v37 = vpop.eup %2575  ;;  %v1596_v35 = vld [vmem:[%s3666_s23 + $0x48] sm:$0xff] }
 0x5b0   : > { %v1349_v15 = vmul.f32 %v2576_v37, %v3254_v3  ;;  %v1587_v3 = vld [vmem:[%s3666_s23] sm:$0xff]  ;;  %v1629_v37 = vld [vmem:[%s3666_s23 + $0x150] sm:$0xff] }
 0x5b2   : > { %v1410_v44 = vrot.slane %v1349_v15, 7  ;;  %v1630_v15 = vld [vmem:[%s3666_s23 + $0x158] sm:$0xff] }
 0x5b9   : > { %v2578_v38 = vpop.eup %2577 }
 0x5ba   : > { %v1342_v39 = vrot.slane %v2578_v38, 1  ;;  %v1343_v23 = vrot.slane %v2578_v38, 2  ;;  %v1344_v16 = vrot.slane %v2578_v38, 3  ;;  %v2448_v38 = vpack.c.bf16 %v1596_v35, %v1595_v34 }
 0x5bc   : > { %v1350_v40 = vmul.f32 %v1342_v39, %v3260_v61  ;;  %v1351_v41 = vmul.f32 %v1343_v23, %v3263_v14  ;;  %v1352_v42 = vmul.f32 %v1344_v16, %v3266_v17  ;;  %v1588_v61 = vld [vmem:[%s3666_s23 + $0x8] sm:$0xff]  ;;  %v1613_v39 = vld [vmem:[%s3666_s23 + $0xd0] sm:$0xff]  ;;  %v1614_v23 = vld [vmem:[%s3666_s23 + $0xd8] sm:$0xff] }
 0x5bd   : > { %v2432_v52 = vpack.c.bf16 %v1588_v61, %v1587_v3  ;;  %v2450_v16 = vpack.c.bf16 %v1614_v23, %v1613_v39  ;;  %v1631_v3 = vld [vmem:[%s3666_s23 + $0x160] sm:$0xff]  ;;  %v1632_v61 = vld [vmem:[%s3666_s23 + $0x168] sm:$0xff] }
 0x5be   : > { %v1411_v14 = vrot.slane %v1350_v40, 6  ;;  %v1413_v45 = vrot.slane %v1351_v41, 5  ;;  %v1415_v46 = vrot.slane %v1352_v42, 4  ;;  %v1597_v40 = vld [vmem:[%s3666_s23 + $0x50] sm:$0xff]  ;;  %v1598_v41 = vld [vmem:[%s3666_s23 + $0x58] sm:$0xff]  ;;  %v2478_v42 = vpack.c.bf16 %v1630_v15, %v1629_v37 }
 0x5c0   : > { %v1412_v17 = vsel %vm586_vm2, %v1411_v14, %v1410_v44  ;;  %v2452_v44 = vpack.c.bf16 %v1598_v41, %v1597_v40  ;;  %v2454_v14 = vpack.c.bf16 %v1616_v43, %v1615_v24 }
 0x5c1   : > { %v1414_v57 = vsel %vm589_vm3, %v1413_v45, %v1412_v17  ;;  %v1599_v45 = vld [vmem:[%s3666_s23 + $0x60] sm:$0xff]  ;;  %v1600_v17 = vld [vmem:[%s3666_s23 + $0x68] sm:$0xff] }
 0x5c2   : > { %v1416_v58 = vsel %vm592_vm4, %v1415_v46, %v1414_v57  ;;  %v2481_v46 = vpack.c.bf16 %v1632_v61, %v1631_v3  ;;  %v1633_v57 = vld [vmem:[%s3666_s23 + $0x170] sm:$0xff]  ;;  %v2456_v59 = vpack.c.bf16 %v1600_v17, %v1599_v45  ;;  %v1927_v3 = vld [vmem:[%s3668_s13] ss:$0 sm:$0xff] }
 0x5c3   : > { %1925 = vmatmul.mubr.msk.f32.vlgmr.msra.gmra.mrb[8].mxu1 %vm507_vm0, %v1416_v58  ;;  %2243 = vmatmul.mubr.msk.f32.vlgmr.msra.gmra.mrb[8].mxu0 %vm507_vm0, %v1416_v58  ;;  %v1634_v58 = vld [vmem:[%s3666_s23 + $0x178] sm:$0xff] }
 0x5c4   : > { %2464 = vmatpush3.bf16.msra.mxu0 %v2463_v51  ;;  %2433 = vmatpush3.bf16.msra.mxu1 %v2432_v52  ;;  %v1617_v51 = vld [vmem:[%s3666_s23 + $0xf0] sm:$0xff]  ;;  %v1618_v52 = vld [vmem:[%s3666_s23 + $0xf8] sm:$0xff]  ;;  %v2484_v0 = vpack.c.bf16 %v1634_v58, %v1633_v57 }
 0x5c5   : > { %2465 = vmatprep.subr.bf16.mxu0 %v2719_v36  ;;  %2277 = vmatprep.mubr.msk.f32.mxu0 %vm2720_vm1, %v2721_v7  ;;  %v1589_v7 = vld [vmem:[%s3666_s23 + $0x10] sm:$0xff]  ;;  %v2458_v60 = vpack.c.bf16 %v1618_v52, %v1617_v51 }
 0x5c6   : > { %v2436_v4 = vpack.c.bf16 %v1590_v63, %v1589_v7  ;;  %2435 = vmatprep.subr.bf16.mxu1 %v2434_v5  ;;  %v1401_v7 = vsub.s32 2, %v3169_v20  ;;  %v1389_v63 = vld [vmem:[%s3667_s24] sm:$0x7]  ;;  %s2643_s24 = scalar_lea.vmem %s3569_s27, 64 }
 0x5c7   : > { %v1394_v6 = vrot.slane %v1389_v63, %v3176_v31  ;;  %p2644_p4 = scmp.ne.s32.totalorder %s3569_s27, %s2643_s24  ;;  %p2651_p13 = scmp.lt.s32.totalorder %s2649_s21, %s2643_s24 }
 0x5c8   : > { %2467 = vmatpush3.bf16.msra.mxu0 %v2466_v1  ;;  %2437 = vmatpush3.bf16.msra.mxu1 %v2436_v4  ;;  %v1601_v1 = vld [vmem:[%s3666_s23 + $0x70] sm:$0xff]  ;;  %v1397_v4 = vsub.s32 1, %v3169_v20  ;;  %v1402_v9 = vrot.slane %v1389_v63, %v1401_v7 }
 0x5c9   : > { %2468 = vmatprep.subr.bf16.mxu0 %v2719_v36  ;;  %2439 = vmatprep.subr.bf16.mxu1 %v2438_v47  ;;  %v2460_v5 = vpack.c.bf16 %v1602_v2, %v1601_v1  ;;  %p2645_p6 = pnand %p2644_p4, %p2895_p12  ;;  %p2652_p3 = por %p2651_p13, %p2650_p10 }
 0x5cb   : > { %p2646_p8 = pneg %p2645_p6 }
 0x5cc   : > { %2470 = vmatpush3.bf16.msra.mxu0 %v2469_v11  ;;  %2441 = vmatpush3.bf16.msra.mxu1 %v2440_v18  ;;  %v1398_v11 = vrot.slane %v1389_v63, %v1397_v4 }
 0x5cd   : > { %2471 = vmatprep.subr.bf16.mxu0 %v2719_v36  ;;  %2443 = vmatprep.subr.bf16.mxu1 %v2442_v26  ;;  %p2653_p7 = pnand %p2652_p3, %p2646_p8 }
 0x5d0   : > { %2473 = vmatpush3.bf16.msra.mxu0 %v2472_v22  ;;  %2445 = vmatpush3.bf16.msra.mxu1 %v2444_v28 }
 0x5d1   : > { %2474 = vmatprep.subr.bf16.mxu0 %v2719_v36  ;;  %2447 = vmatprep.subr.bf16.mxu1 %v2446_v33 }
 0x5d4   : > { %2476 = vmatpush3.bf16.msra.mxu0 %v2475_v32  ;;  %2449 = vmatpush3.bf16.msra.mxu1 %v2448_v38 }
 0x5d5   : > { %2477 = vmatprep.subr.bf16.mxu0 %v2719_v36  ;;  %2451 = vmatprep.subr.bf16.mxu1 %v2450_v16 }
 0x5d8   : > { %2479 = vmatpush3.bf16.msra.mxu0 %v2478_v42  ;;  %2453 = vmatpush3.bf16.msra.mxu1 %v2452_v44 }
 0x5d9   : > { %2480 = vmatprep.subr.bf16.mxu0 %v2719_v36  ;;  %2455 = vmatprep.subr.bf16.mxu1 %v2454_v14 }
 0x5dc   : > { %2482 = vmatpush3.bf16.msra.mxu0 %v2481_v46  ;;  %2457 = vmatpush3.bf16.msra.mxu1 %v2456_v59 }
 0x5dd   : > { %2483 = vmatprep.subr.bf16.mxu0 %v2719_v36  ;;  %2459 = vmatprep.subr.bf16.mxu1 %v2458_v60 }
 0x5e0   : > { %2485 = vmatpush3.bf16.msra.mxu0 %v2484_v0  ;;  %2461 = vmatpush3.bf16.msra.mxu1 %v2460_v5 }
 0x696   : > { %v1485_v12 = vpop.f32.mrb[8].mxu1  ;;  %v1556_v13 = vpop.f32.mrb[8].mxu0 }
 0x697   : > { %v1486_v36 = vadd.f32 %v1485_v12, %v1394_v6  ;;  %v1557_v47 = vadd.f32 %v1556_v13, %v1402_v9  ;;  %v1487_v48 = vpop.f32.mrb[9].mxu1  ;;  %v2244_v62 = vpop.f32.mrb[9].mxu0 }
 0x698   : > { %v1488_v18 = vadd.f32 %v1487_v48, %v1398_v11 }
 0x699   : > { %v1563_v19 = vmul.f32 0.044715, %v1486_v36  ;;  %v1565_v21 = vmul.f32 0.044715, %v1557_v47  ;;  %v1562_v34 = vmul.f32 0.5, %v1557_v47  ;;  %v1560_v23 = vmul.f32 0.5, %v1486_v36 }
 0x69a   : > { %v1564_v22 = vmul.f32 0.044715, %v1488_v18  ;;  %v1561_v38 = vmul.f32 0.5, %v1488_v18 }
 0x69b   : > { %v1566_v49 = vmul.f32 %v1563_v19, %v1486_v36  ;;  %v1568_v25 = vmul.f32 %v1565_v21, %v1557_v47 }
 0x69c   : > { %v1567_v26 = vmul.f32 %v1564_v22, %v1488_v18 }
 0x69d   : > { %v1569_v8 = vmul.f32 %v1566_v49, %v1486_v36  ;;  %v1571_v27 = vmul.f32 %v1568_v25, %v1557_v47 }
 0x69e   : > { %v1570_v20 = vmul.f32 %v1567_v26, %v1488_v18 }
 0x69f   : > { %v1572_v50 = vadd.f32 %v1569_v8, %v1486_v36  ;;  %v1574_v31 = vadd.f32 %v1571_v27, %v1557_v47 }
 0x6a0   : > { %v1573_v28 = vadd.f32 %v1570_v20, %v1488_v18 }
 0x6a1   : > { %v1577_v29 = vmul.f32 0.7978846, %v1574_v31  ;;  %v1575_v30 = vmul.f32 0.7978846, %v1572_v50 }
 0x6a2   : > { %v1576_v10 = vmul.f32 0.7978846, %v1573_v28 }
 0x6a3   : > { %2579 = vtanh.f32 %v1577_v29 }
 0x6a4   : > { %2581 = vtanh.f32 %v1576_v10 }
 0x6a5   : > { %2583 = vtanh.f32 %v1575_v30 }
 0x6ad   : > { %v2580_v32 = vpop.eup %2579 }
 0x6ae   : > { %v2582_v33 = vpop.eup %2581  ;;  %v1583_v35 = vadd.f32 1.0, %v2580_v32 }
 0x6af   : > { %v2584_v37 = vpop.eup %2583  ;;  %v1582_v15 = vadd.f32 1.0, %v2582_v33 }
 0x6b0   : > { %v1586_v39 = vmul.f32 %v1583_v35, %v1562_v34  ;;  %v1581_v16 = vadd.f32 1.0, %v2584_v37 }
 0x6b1   : > { %v1585_v40 = vmul.f32 %v1582_v15, %v1561_v38 }
 0x6b2   : > { %2278 = vmatmul.mubr.f32.vlgmr.msra.gmra.mrb[10].mxu0 %v1586_v39  ;;  %v1584_v41 = vmul.f32 %v1581_v16, %v1560_v23 }
 0x6b3   : > { %1706 = vmatprep.mubr.f32.mxu1 %v1585_v40 }
 0x6b4   : > { %1707 = vmatmul.mubr.f32.vlgmr.msra.gmra.mrb[10].mxu1 %v1584_v41 }
 0x785   : > { %v1778_v42 = vpop.f32.mrb[10].mxu0 }
 0x786   : > { %v2279_v24 = vpop.f32.mrb[11].mxu0 }
 0x787   : > { %v2054_v43 = vpop.f32.mrb[10].mxu1 }
 0x788   : > { %v2055_v61 = vpop.f32.mrb[11].mxu1 }
 0x789   : > { %v2056_v44 = vadd.f32 %v2055_v61, %v2054_v43 }
 0x78b   : > { %v1709_v14 = vadd.f32 %v2056_v44, %v1927_v3 }
 0x78d   : > { %v1779_v45 = vadd.f32 %v1778_v42, %v1709_v14 }
 0x78f   : > { %v1783_v17 = vrot.slane %v1779_v45, 1  ;;  %v1784_v46 = vrot.slane %v1779_v45, 2  ;;  %v1785_v51 = vrot.slane %v1779_v45, 3  ;;  %v1786_v52 = vrot.slane %v1779_v45, 4 }
 0x791   : > { %v1791_v57 = vadd.f32 %v1783_v17, %v3240_v55  ;;  %v1792_v58 = vadd.f32 %v1784_v46, %v3234_v53  ;;  %v1793_v59 = vadd.f32 %v1785_v51, %v3237_v54  ;;  %v1794_v60 = vadd.f32 %v1786_v52, %v3243_v56 }
 0x793   : > { %1795 = vst.msk [vmem:[%s500_s26 - $0x7] sm:$0x80] %vm1290_vm6, %v1791_v57  ;;  %1796 = vst.msk [vmem:[%s500_s26 - $0x6] sm:$0x80] %vm1290_vm6, %v1792_v58 }
 0x794   : > { %1797 = vst.msk [vmem:[%s500_s26 - $0x5] sm:$0x80] %vm1290_vm6, %v1793_v59  ;;  %1798 = vst.msk [vmem:[%s500_s26 - $0x4] sm:$0x80] %vm1290_vm6, %v1794_v60 }
 0x795   : > { %2656 = shalt.err (!%p2653_p7)
}
 0x796   : > { %s2657_s13 = scalar_lea.hbm %s3567_s29, 64  ;;  %s2661_s20 = scalar_lea.hbm %s3669_s22, 128 }
 0x797   : > { %p2658_p9 = scmp.ne.s32.totalorder %s3567_s29, %s2657_s13  ;;  %p2662_p5 = scmp.lt.u32.totalorder %s3567_s29, %s3669_s22 }
 0x798   : > { %p2663_p2 = scmp.lt.u32.totalorder %s2661_s20, %s2657_s13  ;;  %p2665_p4 = scmp.lt.u32.totalorder %s2657_s13, %s3567_s29 }
 0x799   : > { %p2659_p1 = pnand %p2658_p9, %p2895_p12 }
 0x79a   : > { %p2664_p11 = por %p2663_p2, %p2662_p5 }
 0x79b   : > { %p2660_p0 = pneg %p2659_p1 }
 0x79c   : > { %p2666_p6 = por %p2665_p4, %p2664_p11 }
 0x79e   : > { %p2667_p8 = pnand %p2666_p6, %p2660_p0 }
 0x7a0   : > { %2670 = shalt.err (!%p2667_p8)
}
 0x7a1   : > { %s2724_s24 = smov 16   ;;  %s2725_s19 = smov 1  }
 0x7a2   : > { %2492 = dma.vmem_to_hbm [thread:$0]  (%p2895_p12), %s3569_s27, 64, %s3567_s29, %s1800_s17, %s2724_s24, %s2724_s24, %s2725_s19  }
 0x7a3 PF: > { %s3670_s21 = sld [smem:[#allocation11_spill]]  ;;  %s3671_s14 = sld [smem:[#allocation12_spill]] }
 0x7a4   : > { %p3673_p13 = scmp.ge.s32.totalorder %s2713_s16, 2 }
 0x7a9   : > { %s1828_s26 = sand.u32 1, %s3670_s21   ;;  %p3672_p10 = scmp.ne.s32.totalorder %s3671_s14, 0 }
 0x7aa   : > { %s1829_s13 = scalar_lea.sflag [#allocation4], %s1828_s26 }
 0x7ab   : > { %p2503_p3 = pnand %p3673_p13, %p3672_p10 }
 0x7ad   : > { %2696 = dma.done.wait (!%p2503_p3), %s1829_s13, 64  }
 0x7ae   : > { %2698 = vsyncadd (!%p2503_p3), %s1829_s13, 4294967232  ;;  %s3674_s16 = sld [smem:[#allocation13_spill]]  ;;  %s3675_s29 = smov %s2705_s30 }
 0x7af   : > { %s3676_s30 = smov %s2709_s15  ;;  %s3677_s15 = smov %s2891_s25 }
 0x7b4   : > { %p28_p7 = scmp.ge.s32.totalorder %s3674_s16, 4  }
 0x7b6   :  { %30 = sbr.rel (!%p28_p7) target bundleno = 11 (0xb), region = 125 }
 0x7bd   :  { %1834 = vsyncpa [#allocation3], 1 }
 0x7be   :  { %1836 = vsyncpa [#allocation3 + $0x1], 1 }
 0x7bf   :  { %1837 = vsyncpa [#allocation6], 1 }
 0x7c0   :  { %1838 = vsyncpa [#allocation4], 1 }
 0x7c1   :  { %1840 = vsyncpa [#allocation4 + $0x1], 1 }

</bundles_post_ra>
